<compile_context>
chip_gen: v6e
topology: v6e:2x2x1
jax: 0.10.0
libtpu: 0.0.40
codegen_flags: <defaults>
</compile_context>

<pallas_src>
import jax
import jax.numpy as jnp
from jax import lax
from jax.experimental import pallas as pl
from jax.experimental.pallas import tpu as pltpu

COMPUTE_DTYPE = jnp.bfloat16   # MXU operand dtype (accumulation stays f32)
LANES = 128                    # padded channel / class width


# ----------------------------- Pallas kernels ------------------------------

def conv_pool_relu_kernel(p_ref, w_ref, b_ref, o_ref):
    # p_ref: (4, TM, Kp)  patches for the 4 positions of each 2x2 pool window
    # w_ref: (Kp, 128)    conv weight (K and O zero-padded)
    # b_ref: (1, 128)     conv bias (zero-padded), f32
    # o_ref: (TM, 128)    relu(maxpool(conv)) output, channels on lanes
    w = w_ref[...]
    acc = jnp.dot(p_ref[0], w, preferred_element_type=jnp.float32)
    for q in range(1, 4):
        acc = jnp.maximum(
            acc, jnp.dot(p_ref[q], w, preferred_element_type=jnp.float32))
    o_ref[...] = jnp.maximum(acc + b_ref[...], 0.0).astype(o_ref.dtype)


def mlp_head_kernel(a_ref, w1_ref, b1_ref, w2_ref, b2_ref, o_ref):
    # a_ref : (TB, 2048) flattened conv features (bf16)
    # w1/b1 : fc1 (permutation + padding folded in), w2/b2 : fc2 (padded)
    h = jnp.dot(a_ref[...], w1_ref[...], preferred_element_type=jnp.float32)
    h = jnp.maximum(h + b1_ref[...], 0.0)
    # TODO(synk): F.dropout between fc1 and fc2 is identity (inference mode).
    logits = jnp.dot(h.astype(w2_ref.dtype), w2_ref[...],
                     preferred_element_type=jnp.float32) + b2_ref[...]
    # Only the first 10 lanes are real classes; mask padding before softmax.
    lane = lax.broadcasted_iota(jnp.int32, logits.shape, 1)
    logits = jnp.where(lane < 10, logits, jnp.float32(-1e30))
    m = jnp.max(logits, axis=-1, keepdims=True)
    s = logits - m
    lse = jnp.log(jnp.sum(jnp.exp(s), axis=-1, keepdims=True))
    o_ref[...] = (s - lse).astype(o_ref.dtype)


# ------------------------------ host wrappers -------------------------------

def conv_pool_relu(patches, w, b, *, block_rows=512):
    # patches: (4, M, Kp); w: (Kp, 128); b: (1, 128)  ->  (M, 128) bf16
    _, M, Kp = patches.shape
    N = w.shape[1]
    tm = min(block_rows, M)
    cost = pl.CostEstimate(
        flops=2 * 4 * M * Kp * N, transcendentals=0,
        bytes_accessed=int(patches.size * patches.dtype.itemsize
                           + w.size * w.dtype.itemsize + M * N * 2))
    return pl.pallas_call(
        conv_pool_relu_kernel,
        out_shape=jax.ShapeDtypeStruct((M, N), COMPUTE_DTYPE),
        grid=(pl.cdiv(M, tm),),
        in_specs=[
            pl.BlockSpec((4, tm, Kp), lambda i: (0, i, 0)),
            pl.BlockSpec((Kp, N), lambda i: (0, 0)),
            pl.BlockSpec((1, N), lambda i: (0, 0)),
        ],
        out_specs=pl.BlockSpec((tm, N), lambda i: (i, 0)),
        compiler_params=pltpu.CompilerParams(
            dimension_semantics=("parallel",)),
        cost_estimate=cost,
    )(patches, w, b)


def mlp_head(a, w1, b1, w2, b2, *, block_rows=256):
    # a: (B, 2048) bf16  ->  (B, 128) f32 log-probs (first 10 lanes valid)
    B, F = a.shape
    N = w2.shape[1]
    tb = min(block_rows, B)
    return pl.pallas_call(
        mlp_head_kernel,
        out_shape=jax.ShapeDtypeStruct((B, N), jnp.float32),
        grid=(pl.cdiv(B, tb),),
        in_specs=[
            pl.BlockSpec((tb, F), lambda i: (i, 0)),
            pl.BlockSpec(w1.shape, lambda i: (0, 0)),
            pl.BlockSpec((1, w1.shape[1]), lambda i: (0, 0)),
            pl.BlockSpec(w2.shape, lambda i: (0, 0)),
            pl.BlockSpec((1, N), lambda i: (0, 0)),
        ],
        out_specs=pl.BlockSpec((tb, N), lambda i: (i, 0)),
        compiler_params=pltpu.CompilerParams(
            dimension_semantics=("parallel",)),
    )(a, w1, b1, w2, b2)


def _conv_pool_patches(x, k, k_pad):
    # x: (B, H, W, C) NHWC.  Builds patches for a fused conv(k,'VALID') +
    # 2x2 maxpool: returns (4, B*Hp*Wp, k_pad) with
    #   out[dy*2+dx, b*Hp*Wp + hp*Wp + wp, c*k*k + i*k + j]
    #     = x[b, 2*hp + dy + i, 2*wp + dx + j, c]
    # (K ordering matches the PyTorch (O, C, kh, kw) weight flatten.)
    B, H, W, C = x.shape
    Ho, Wo = H - k + 1, W - k + 1
    assert Ho % 2 == 0 and Wo % 2 == 0, "conv output must be 2x2-poolable"
    Hp, Wp = Ho // 2, Wo // 2
    hidx = (2 * jnp.arange(Hp)[:, None, None]
            + jnp.arange(2)[None, :, None]
            + jnp.arange(k)[None, None, :]).reshape(-1)
    widx = (2 * jnp.arange(Wp)[:, None, None]
            + jnp.arange(2)[None, :, None]
            + jnp.arange(k)[None, None, :]).reshape(-1)
    t = jnp.take(x, hidx, axis=1)                       # (B, Hp*2*k, W, C)
    t = jnp.take(t, widx, axis=2)                       # (B, Hp*2*k, Wp*2*k, C)
    t = t.reshape(B, Hp, 2, k, Wp, 2, k, C)
    t = t.transpose(2, 5, 0, 1, 4, 7, 3, 6)             # (dy,dx,B,Hp,Wp,C,i,j)
    t = t.reshape(4, B * Hp * Wp, C * k * k)
    if k_pad > C * k * k:
        t = jnp.pad(t, ((0, 0), (0, 0), (0, k_pad - C * k * k)))
    return t, (Hp, Wp)


def prepare_params(params):
    """One-time packing: pad channels to 128 lanes, pad K, fold the NCHW
    flatten permutation (and the 128-channel padding) into fc1's weight."""
    def pad2(a, r, c):
        return jnp.zeros((r, c), jnp.float32).at[:a.shape[0], :a.shape[1]].set(a)

    def padb(b, n=LANES):
        return jnp.zeros((1, n), jnp.float32).at[0, :b.shape[0]].set(b)

    c1 = params["conv1_w"].reshape(10, 25).T            # (25, 10)
    c2 = params["conv2_w"].reshape(20, 250).T           # (250, 20)

    # fc1: torch feature index = c*16 + s (s = h*4 + w); our flattened
    # activation index = s*128 + c (c padded to 128 lanes).
    f1 = params["fc1_w"].reshape(50, 20, 16).transpose(2, 1, 0)   # (s, c, n)
    f1_full = jnp.zeros((16, LANES, 50), jnp.float32).at[:, :20, :].set(f1)
    f1_full = f1_full.reshape(16 * LANES, 50)

    f2 = params["fc2_w"].T                              # (50, 10)

    return {
        "c1_w": pad2(c1, 32, LANES).astype(COMPUTE_DTYPE),
        "c1_b": padb(params["conv1_b"]),
        "c2_w": pad2(c2, 256, LANES).astype(COMPUTE_DTYPE),
        "c2_b": padb(params["conv2_b"]),
        "fc1_w": pad2(f1_full, 16 * LANES, LANES).astype(COMPUTE_DTYPE),
        "fc1_b": padb(params["fc1_b"]),
        "fc2_w": pad2(f2, LANES, LANES).astype(COMPUTE_DTYPE),
        "fc2_b": padb(params["fc2_b"]),
    }


def cnn_forward(x_nchw, prep):
    B = x_nchw.shape[0]
    assert x_nchw.shape[1:] == (1, 28, 28), "model expects (B, 1, 28, 28)"
    # NCHW with C=1 -> NHWC is a pure (free) reshape.
    x = x_nchw.reshape(B, 28, 28, 1).astype(COMPUTE_DTYPE)

    # conv1 + bias + maxpool2 + relu (fused)
    p1, (h1, w1) = _conv_pool_patches(x, 5, 32)            # (4, B*144, 32)
    a1 = conv_pool_relu(p1, prep["c1_w"], prep["c1_b"])    # (B*144, 128)
    a1 = a1.reshape(B, h1, w1, LANES)[..., :10]            # (B, 12, 12, 10)

    # conv2 (+ identity Dropout2d) + bias + maxpool2 + relu (fused)
    p2, (h2, w2) = _conv_pool_patches(a1, 5, 256)          # (4, B*16, 256)
    a2 = conv_pool_relu(p2, prep["c2_w"], prep["c2_b"])    # (B*16, 128)

    # fc1 + relu + (identity dropout) + fc2 + log_softmax (fused);
    # the torch .view(-1, 320) permutation is folded into fc1's weight.
    feats = a2.reshape(B, h2 * w2 * LANES)                 # (B, 2048)
    logp = mlp_head(feats, prep["fc1_w"], prep["fc1_b"],
                    prep["fc2_w"], prep["fc2_b"])          # (B, 128)
    return logp[:, :10]


def init_params(key):
    ks = jax.random.split(key, 8)

    def u(k, shape, fan_in):
        bound = 1.0 / jnp.sqrt(jnp.float32(fan_in))
        return jax.random.uniform(k, shape, jnp.float32, -bound, bound)

    return {
        "conv1_w": u(ks[0], (10, 1, 5, 5), 1 * 5 * 5),
        "conv1_b": u(ks[1], (10,), 1 * 5 * 5),
        "conv2_w": u(ks[2], (20, 10, 5, 5), 10 * 5 * 5),
        "conv2_b": u(ks[3], (20,), 10 * 5 * 5),
        "fc1_w":   u(ks[4], (50, 320), 320),
        "fc1_b":   u(ks[5], (50,), 320),
        "fc2_w":   u(ks[6], (10, 50), 50),
        "fc2_b":   u(ks[7], (10,), 50),
    }


if __name__ == "__main__":
    key = jax.random.PRNGKey(0)
    pkey, xkey = jax.random.split(key)
    params = init_params(pkey)
    prep = prepare_params(params)          # one-time weight packing
    # 28x28 single-channel input so the flatten yields 320 features (20*4*4).
    x = jax.random.normal(xkey, (2, 1, 28, 28), jnp.float32)  # NCHW like torch
    out = jax.jit(cnn_forward)(x, prep)
    jax.block_until_ready(out)
    assert out.shape == (2, 10)
    assert bool(jnp.all(jnp.isfinite(out)))
    print("KERNEL_OK")
</pallas_src>

<mosaic_0001>
module attributes {stable_mosaic.version = 11 : i64} {
  func.func @conv_pool_relu_kernel(%arg0: i32, %arg1: memref<4x288x32xbf16, #tpu.memory_space<vmem>>, %arg2: memref<32x128xbf16, #tpu.memory_space<vmem>>, %arg3: memref<1x128xf32, #tpu.memory_space<vmem>>, %arg4: memref<288x128xbf16, #tpu.memory_space<vmem>>) attributes {dimension_semantics = [#tpu.dimension_semantics<parallel>], iteration_bounds = array<i64: 1>, scalar_prefetch = 0 : i64, scratch_operands = 0 : i64, tpu.core_type = #tpu.core_type<tc>, window_params = [{transform_indices = @transform_0, window_bounds = array<i64: 4, 288, 32>}, {pipeline_mode = #tpu.pipeline_mode<synchronous>, transform_indices = @transform_1, window_bounds = array<i64: 32, 128>}, {pipeline_mode = #tpu.pipeline_mode<synchronous>, transform_indices = @transform_2, window_bounds = array<i64: 1, 128>}, {transform_indices = @transform_3, window_bounds = array<i64: 288, 128>}]} {
    %c0 = arith.constant 0 : index
    %c0_0 = arith.constant 0 : index
    %0 = vector.load %arg2[%c0, %c0_0] : memref<32x128xbf16, #tpu.memory_space<vmem>>, vector<32x128xbf16>
    %c0_1 = arith.constant 0 : index
    %c0_2 = arith.constant 0 : index
    %c0_3 = arith.constant 0 : index
    %1 = vector.load %arg1[%c0_1, %c0_2, %c0_3] : memref<4x288x32xbf16, #tpu.memory_space<vmem>>, vector<1x288x32xbf16>
    %2 = vector.shape_cast %1 : vector<1x288x32xbf16> to vector<288x32xbf16>
    %cst = arith.constant dense<0.000000e+00> : vector<288x128xf32>
    %3 = tpu.matmul %2, %0, %cst {dimension_numbers = #tpu.dot_dimension_numbers<[1], [0], [0], [1], [0, 0, 1, 1], [], []>} : vector<288x32xbf16>, vector<32x128xbf16>, vector<288x128xf32> -> vector<288x128xf32>
    %c1 = arith.constant 1 : index
    %c0_4 = arith.constant 0 : index
    %c0_5 = arith.constant 0 : index
    %4 = vector.load %arg1[%c1, %c0_4, %c0_5] : memref<4x288x32xbf16, #tpu.memory_space<vmem>>, vector<1x288x32xbf16>
    %5 = vector.shape_cast %4 : vector<1x288x32xbf16> to vector<288x32xbf16>
    %cst_6 = arith.constant dense<0.000000e+00> : vector<288x128xf32>
    %6 = tpu.matmul %5, %0, %cst_6 {dimension_numbers = #tpu.dot_dimension_numbers<[1], [0], [0], [1], [0, 0, 1, 1], [], []>} : vector<288x32xbf16>, vector<32x128xbf16>, vector<288x128xf32> -> vector<288x128xf32>
    %7 = arith.maximumf %3, %6 : vector<288x128xf32>
    %c2 = arith.constant 2 : index
    %c0_7 = arith.constant 0 : index
    %c0_8 = arith.constant 0 : index
    %8 = vector.load %arg1[%c2, %c0_7, %c0_8] : memref<4x288x32xbf16, #tpu.memory_space<vmem>>, vector<1x288x32xbf16>
    %9 = vector.shape_cast %8 : vector<1x288x32xbf16> to vector<288x32xbf16>
    %cst_9 = arith.constant dense<0.000000e+00> : vector<288x128xf32>
    %10 = tpu.matmul %9, %0, %cst_9 {dimension_numbers = #tpu.dot_dimension_numbers<[1], [0], [0], [1], [0, 0, 1, 1], [], []>} : vector<288x32xbf16>, vector<32x128xbf16>, vector<288x128xf32> -> vector<288x128xf32>
    %11 = arith.maximumf %7, %10 : vector<288x128xf32>
    %c3 = arith.constant 3 : index
    %c0_10 = arith.constant 0 : index
    %c0_11 = arith.constant 0 : index
    %12 = vector.load %arg1[%c3, %c0_10, %c0_11] : memref<4x288x32xbf16, #tpu.memory_space<vmem>>, vector<1x288x32xbf16>
    %13 = vector.shape_cast %12 : vector<1x288x32xbf16> to vector<288x32xbf16>
    %cst_12 = arith.constant dense<0.000000e+00> : vector<288x128xf32>
    %14 = tpu.matmul %13, %0, %cst_12 {dimension_numbers = #tpu.dot_dimension_numbers<[1], [0], [0], [1], [0, 0, 1, 1], [], []>} : vector<288x32xbf16>, vector<32x128xbf16>, vector<288x128xf32> -> vector<288x128xf32>
    %15 = arith.maximumf %11, %14 : vector<288x128xf32>
    %c0_13 = arith.constant 0 : index
    %c0_14 = arith.constant 0 : index
    %16 = vector.load %arg3[%c0_13, %c0_14] : memref<1x128xf32, #tpu.memory_space<vmem>>, vector<1x128xf32>
    %17 = vector.broadcast %16 : vector<1x128xf32> to vector<288x128xf32>
    %18 = arith.addf %15, %17 : vector<288x128xf32>
    %cst_15 = arith.constant 0.000000e+00 : f32
    %19 = vector.broadcast %cst_15 : f32 to vector<288x128xf32>
    %20 = arith.maximumf %18, %19 : vector<288x128xf32>
    %21 = arith.truncf %20 : vector<288x128xf32> to vector<288x128xbf16>
    %c0_16 = arith.constant 0 : index
    %c0_17 = arith.constant 0 : index
    %22 = vector.load %arg4[%c0_16, %c0_17] : memref<288x128xbf16, #tpu.memory_space<vmem>>, vector<288x128xbf16>
    tpu.vector_store %arg4[%c0_16, %c0_17], %21 {strides = array<i32>} : memref<288x128xbf16, #tpu.memory_space<vmem>>, vector<288x128xbf16>,
    return
  }
  func.func @transform_0(%arg0: i32) -> (i32, i32, i32) {
    %c0_i32 = arith.constant 0 : i32
    %c0_i32_0 = arith.constant 0 : i32
    %c0_i32_1 = arith.constant 0 : i32
    return %c0_i32, %arg0, %c0_i32_0 : i32, i32, i32
  }
  func.func @transform_1(%arg0: i32) -> (i32, i32) {
    %c0_i32 = arith.constant 0 : i32
    %c0_i32_0 = arith.constant 0 : i32
    %c0_i32_1 = arith.constant 0 : i32
    return %c0_i32, %c0_i32_0 : i32, i32
  }
  func.func @transform_2(%arg0: i32) -> (i32, i32) {
    %c0_i32 = arith.constant 0 : i32
    %c0_i32_0 = arith.constant 0 : i32
    %c0_i32_1 = arith.constant 0 : i32
    return %c0_i32, %c0_i32_0 : i32, i32
  }
  func.func @transform_3(%arg0: i32) -> (i32, i32) {
    %c0_i32 = arith.constant 0 : i32
    %c0_i32_0 = arith.constant 0 : i32
    return %arg0, %c0_i32 : i32, i32
  }
}

module attributes {stable_mosaic.version = 11 : i64} {
  func.func @conv_pool_relu_kernel(%arg0: i32, %arg1: memref<4x32x256xbf16, #tpu.memory_space<vmem>>, %arg2: memref<256x128xbf16, #tpu.memory_space<vmem>>, %arg3: memref<1x128xf32, #tpu.memory_space<vmem>>, %arg4: memref<32x128xbf16, #tpu.memory_space<vmem>>) attributes {dimension_semantics = [#tpu.dimension_semantics<parallel>], iteration_bounds = array<i64: 1>, scalar_prefetch = 0 : i64, scratch_operands = 0 : i64, tpu.core_type = #tpu.core_type<tc>, window_params = [{transform_indices = @transform_0, window_bounds = array<i64: 4, 32, 256>}, {pipeline_mode = #tpu.pipeline_mode<synchronous>, transform_indices = @transform_1, window_bounds = array<i64: 256, 128>}, {pipeline_mode = #tpu.pipeline_mode<synchronous>, transform_indices = @transform_2, window_bounds = array<i64: 1, 128>}, {transform_indices = @transform_3, window_bounds = array<i64: 32, 128>}]} {
    %c0 = arith.constant 0 : index
    %c0_0 = arith.constant 0 : index
    %0 = vector.load %arg2[%c0, %c0_0] : memref<256x128xbf16, #tpu.memory_space<vmem>>, vector<256x128xbf16>
    %c0_1 = arith.constant 0 : index
    %c0_2 = arith.constant 0 : index
    %c0_3 = arith.constant 0 : index
    %1 = vector.load %arg1[%c0_1, %c0_2, %c0_3] : memref<4x32x256xbf16, #tpu.memory_space<vmem>>, vector<1x32x256xbf16>
    %2 = vector.shape_cast %1 : vector<1x32x256xbf16> to vector<32x256xbf16>
    %cst = arith.constant dense<0.000000e+00> : vector<32x128xf32>
    %3 = tpu.matmul %2, %0, %cst {dimension_numbers = #tpu.dot_dimension_numbers<[1], [0], [0], [1], [0, 0, 1, 1], [], []>} : vector<32x256xbf16>, vector<256x128xbf16>, vector<32x128xf32> -> vector<32x128xf32>
    %c1 = arith.constant 1 : index
    %c0_4 = arith.constant 0 : index
    %c0_5 = arith.constant 0 : index
    %4 = vector.load %arg1[%c1, %c0_4, %c0_5] : memref<4x32x256xbf16, #tpu.memory_space<vmem>>, vector<1x32x256xbf16>
    %5 = vector.shape_cast %4 : vector<1x32x256xbf16> to vector<32x256xbf16>
    %cst_6 = arith.constant dense<0.000000e+00> : vector<32x128xf32>
    %6 = tpu.matmul %5, %0, %cst_6 {dimension_numbers = #tpu.dot_dimension_numbers<[1], [0], [0], [1], [0, 0, 1, 1], [], []>} : vector<32x256xbf16>, vector<256x128xbf16>, vector<32x128xf32> -> vector<32x128xf32>
    %7 = arith.maximumf %3, %6 : vector<32x128xf32>
    %c2 = arith.constant 2 : index
    %c0_7 = arith.constant 0 : index
    %c0_8 = arith.constant 0 : index
    %8 = vector.load %arg1[%c2, %c0_7, %c0_8] : memref<4x32x256xbf16, #tpu.memory_space<vmem>>, vector<1x32x256xbf16>
    %9 = vector.shape_cast %8 : vector<1x32x256xbf16> to vector<32x256xbf16>
    %cst_9 = arith.constant dense<0.000000e+00> : vector<32x128xf32>
    %10 = tpu.matmul %9, %0, %cst_9 {dimension_numbers = #tpu.dot_dimension_numbers<[1], [0], [0], [1], [0, 0, 1, 1], [], []>} : vector<32x256xbf16>, vector<256x128xbf16>, vector<32x128xf32> -> vector<32x128xf32>
    %11 = arith.maximumf %7, %10 : vector<32x128xf32>
    %c3 = arith.constant 3 : index
    %c0_10 = arith.constant 0 : index
    %c0_11 = arith.constant 0 : index
    %12 = vector.load %arg1[%c3, %c0_10, %c0_11] : memref<4x32x256xbf16, #tpu.memory_space<vmem>>, vector<1x32x256xbf16>
    %13 = vector.shape_cast %12 : vector<1x32x256xbf16> to vector<32x256xbf16>
    %cst_12 = arith.constant dense<0.000000e+00> : vector<32x128xf32>
    %14 = tpu.matmul %13, %0, %cst_12 {dimension_numbers = #tpu.dot_dimension_numbers<[1], [0], [0], [1], [0, 0, 1, 1], [], []>} : vector<32x256xbf16>, vector<256x128xbf16>, vector<32x128xf32> -> vector<32x128xf32>
    %15 = arith.maximumf %11, %14 : vector<32x128xf32>
    %c0_13 = arith.constant 0 : index
    %c0_14 = arith.constant 0 : index
    %16 = vector.load %arg3[%c0_13, %c0_14] : memref<1x128xf32, #tpu.memory_space<vmem>>, vector<1x128xf32>
    %17 = vector.broadcast %16 : vector<1x128xf32> to vector<32x128xf32>
    %18 = arith.addf %15, %17 : vector<32x128xf32>
    %cst_15 = arith.constant 0.000000e+00 : f32
    %19 = vector.broadcast %cst_15 : f32 to vector<32x128xf32>
    %20 = arith.maximumf %18, %19 : vector<32x128xf32>
    %21 = arith.truncf %20 : vector<32x128xf32> to vector<32x128xbf16>
    %c0_16 = arith.constant 0 : index
    %c0_17 = arith.constant 0 : index
    %22 = vector.load %arg4[%c0_16, %c0_17] : memref<32x128xbf16, #tpu.memory_space<vmem>>, vector<32x128xbf16>
    tpu.vector_store %arg4[%c0_16, %c0_17], %21 {strides = array<i32>} : memref<32x128xbf16, #tpu.memory_space<vmem>>, vector<32x128xbf16>,
    return
  }
  func.func @transform_0(%arg0: i32) -> (i32, i32, i32) {
    %c0_i32 = arith.constant 0 : i32
    %c0_i32_0 = arith.constant 0 : i32
    %c0_i32_1 = arith.constant 0 : i32
    return %c0_i32, %arg0, %c0_i32_0 : i32, i32, i32
  }
  func.func @transform_1(%arg0: i32) -> (i32, i32) {
    %c0_i32 = arith.constant 0 : i32
    %c0_i32_0 = arith.constant 0 : i32
    %c0_i32_1 = arith.constant 0 : i32
    return %c0_i32, %c0_i32_0 : i32, i32
  }
  func.func @transform_2(%arg0: i32) -> (i32, i32) {
    %c0_i32 = arith.constant 0 : i32
    %c0_i32_0 = arith.constant 0 : i32
    %c0_i32_1 = arith.constant 0 : i32
    return %c0_i32, %c0_i32_0 : i32, i32
  }
  func.func @transform_3(%arg0: i32) -> (i32, i32) {
    %c0_i32 = arith.constant 0 : i32
    %c0_i32_0 = arith.constant 0 : i32
    return %arg0, %c0_i32 : i32, i32
  }
}

module attributes {stable_mosaic.version = 11 : i64} {
  func.func @mlp_head_kernel(%arg0: i32, %arg1: memref<2x2048xbf16, #tpu.memory_space<vmem>>, %arg2: memref<2048x128xbf16, #tpu.memory_space<vmem>>, %arg3: memref<1x128xf32, #tpu.memory_space<vmem>>, %arg4: memref<128x128xbf16, #tpu.memory_space<vmem>>, %arg5: memref<1x128xf32, #tpu.memory_space<vmem>>, %arg6: memref<2x128xf32, #tpu.memory_space<vmem>>) attributes {dimension_semantics = [#tpu.dimension_semantics<parallel>], iteration_bounds = array<i64: 1>, scalar_prefetch = 0 : i64, scratch_operands = 0 : i64, tpu.core_type = #tpu.core_type<tc>, window_params = [{transform_indices = @transform_0, window_bounds = array<i64: 2, 2048>}, {pipeline_mode = #tpu.pipeline_mode<synchronous>, transform_indices = @transform_1, window_bounds = array<i64: 2048, 128>}, {pipeline_mode = #tpu.pipeline_mode<synchronous>, transform_indices = @transform_2, window_bounds = array<i64: 1, 128>}, {pipeline_mode = #tpu.pipeline_mode<synchronous>, transform_indices = @transform_3, window_bounds = array<i64: 128, 128>}, {pipeline_mode = #tpu.pipeline_mode<synchronous>, transform_indices = @transform_4, window_bounds = array<i64: 1, 128>}, {transform_indices = @transform_5, window_bounds = array<i64: 2, 128>}]} {
    %c0 = arith.constant 0 : index
    %c0_0 = arith.constant 0 : index
    %0 = vector.load %arg1[%c0, %c0_0] : memref<2x2048xbf16, #tpu.memory_space<vmem>>, vector<2x2048xbf16>
    %c0_1 = arith.constant 0 : index
    %c0_2 = arith.constant 0 : index
    %1 = vector.load %arg2[%c0_1, %c0_2] : memref<2048x128xbf16, #tpu.memory_space<vmem>>, vector<2048x128xbf16>
    %cst = arith.constant dense<0.000000e+00> : vector<2x128xf32>
    %2 = tpu.matmul %0, %1, %cst {dimension_numbers = #tpu.dot_dimension_numbers<[1], [0], [0], [1], [0, 0, 1, 1], [], []>} : vector<2x2048xbf16>, vector<2048x128xbf16>, vector<2x128xf32> -> vector<2x128xf32>
    %c0_3 = arith.constant 0 : index
    %c0_4 = arith.constant 0 : index
    %3 = vector.load %arg3[%c0_3, %c0_4] : memref<1x128xf32, #tpu.memory_space<vmem>>, vector<1x128xf32>
    %4 = vector.broadcast %3 : vector<1x128xf32> to vector<2x128xf32>
    %5 = arith.addf %2, %4 : vector<2x128xf32>
    %cst_5 = arith.constant 0.000000e+00 : f32
    %6 = vector.broadcast %cst_5 : f32 to vector<2x128xf32>
    %7 = arith.maximumf %5, %6 : vector<2x128xf32>
    %8 = arith.truncf %7 : vector<2x128xf32> to vector<2x128xbf16>
    %c0_6 = arith.constant 0 : index
    %c0_7 = arith.constant 0 : index
    %9 = vector.load %arg4[%c0_6, %c0_7] : memref<128x128xbf16, #tpu.memory_space<vmem>>, vector<128x128xbf16>
    %cst_8 = arith.constant dense<0.000000e+00> : vector<2x128xf32>
    %10 = tpu.matmul %8, %9, %cst_8 {dimension_numbers = #tpu.dot_dimension_numbers<[1], [0], [0], [1], [0, 0, 1, 1], [], []>} : vector<2x128xbf16>, vector<128x128xbf16>, vector<2x128xf32> -> vector<2x128xf32>
    %c0_9 = arith.constant 0 : index
    %c0_10 = arith.constant 0 : index
    %11 = vector.load %arg5[%c0_9, %c0_10] : memref<1x128xf32, #tpu.memory_space<vmem>>, vector<1x128xf32>
    %12 = vector.broadcast %11 : vector<1x128xf32> to vector<2x128xf32>
    %13 = arith.addf %10, %12 : vector<2x128xf32>
    %14 = tpu.iota {dimensions = array<i32: 1>} : vector<2x128xi32>
    %c10_i32 = arith.constant 10 : i32
    %15 = vector.broadcast %c10_i32 : i32 to vector<2x128xi32>
    %16 = arith.cmpi slt, %14, %15 : vector<2x128xi32>
    %cst_11 = arith.constant -1.000000e+30 : f32
    %17 = vector.broadcast %cst_11 : f32 to vector<2x128xf32>
    %18 = arith.select %16, %13, %17 : vector<2x128xi1>, vector<2x128xf32>
    %cst_12 = arith.constant dense<0xFF800000> : vector<2xf32>
    %19 = vector.multi_reduction <maximumf>, %18, %cst_12 [1] : vector<2x128xf32> to vector<2xf32>
    %20 = vector.shape_cast %19 : vector<2xf32> to vector<2x1xf32>
    %21 = vector.broadcast %20 : vector<2x1xf32> to vector<2x128xf32>
    %22 = arith.subf %18, %21 : vector<2x128xf32>
    %23 = math.exp %22 : vector<2x128xf32>
    %cst_13 = arith.constant dense<0.000000e+00> : vector<2xf32>
    %24 = vector.multi_reduction <add>, %23, %cst_13 [1] : vector<2x128xf32> to vector<2xf32>
    %25 = vector.shape_cast %24 : vector<2xf32> to vector<2x1xf32>
    %26 = math.log %25 : vector<2x1xf32>
    %27 = vector.broadcast %26 : vector<2x1xf32> to vector<2x128xf32>
    %28 = arith.subf %22, %27 : vector<2x128xf32>
    %c0_14 = arith.constant 0 : index
    %c0_15 = arith.constant 0 : index
    %29 = vector.load %arg6[%c0_14, %c0_15] : memref<2x128xf32, #tpu.memory_space<vmem>>, vector<2x128xf32>
    tpu.vector_store %arg6[%c0_14, %c0_15], %28 {strides = array<i32>} : memref<2x128xf32, #tpu.memory_space<vmem>>, vector<2x128xf32>,
    return
  }
  func.func @transform_0(%arg0: i32) -> (i32, i32) {
    %c0_i32 = arith.constant 0 : i32
    %c0_i32_0 = arith.constant 0 : i32
    return %arg0, %c0_i32 : i32, i32
  }
  func.func @transform_1(%arg0: i32) -> (i32, i32) {
    %c0_i32 = arith.constant 0 : i32
    %c0_i32_0 = arith.constant 0 : i32
    %c0_i32_1 = arith.constant 0 : i32
    return %c0_i32, %c0_i32_0 : i32, i32
  }
  func.func @transform_2(%arg0: i32) -> (i32, i32) {
    %c0_i32 = arith.constant 0 : i32
    %c0_i32_0 = arith.constant 0 : i32
    %c0_i32_1 = arith.constant 0 : i32
    return %c0_i32, %c0_i32_0 : i32, i32
  }
  func.func @transform_3(%arg0: i32) -> (i32, i32) {
    %c0_i32 = arith.constant 0 : i32
    %c0_i32_0 = arith.constant 0 : i32
    %c0_i32_1 = arith.constant 0 : i32
    return %c0_i32, %c0_i32_0 : i32, i32
  }
  func.func @transform_4(%arg0: i32) -> (i32, i32) {
    %c0_i32 = arith.constant 0 : i32
    %c0_i32_0 = arith.constant 0 : i32
    %c0_i32_1 = arith.constant 0 : i32
    return %c0_i32, %c0_i32_0 : i32, i32
  }
  func.func @transform_5(%arg0: i32) -> (i32, i32) {
    %c0_i32 = arith.constant 0 : i32
    %c0_i32_0 = arith.constant 0 : i32
    return %arg0, %c0_i32 : i32, i32
  }
}

</mosaic_0001>

<bundles_post_ra>
// kernel: cnn_forward.3
= control target key start
LH: loop header
LB: loop body
LE: loop exit
PB: predicated region body
PF: predicated region fallthrough
CT: control target
= control target key end

     0   :  { %vm157_vm0 = vcmask 261120   ;;  %s3315_s1 = inlined_call_operand.vmem [shape: bf16[32,128], index: 1, kind: input, shape index: {}]   ;;  %s3316_s0 = inlined_call_operand.vmem [shape: bf16[4,288,32], index: 0, kind: input, shape index: {}]   ;;  %s3317_s2 = inlined_call_operand.vmem [shape: f32[1,128], index: 2, kind: input, shape index: {}]   ;;  %s3318_s3 = inlined_call_operand.vmem [shape: bf16[288,128], index: 3, kind: output, shape index: {}]  }
   0x1   :  { %v2508_v0 = vld [vmem:[%s3315_s1 + $0x8] sm:$0xff]   ;;  %v2509_v1 = vld [vmem:[%s3315_s1] sm:$0xff]   ;;  %v2511_v3 = vld [vmem:[%s3316_s0 + $0x90] sm:$0xff]  }
   0x2   :  { %2348 = vmatprep.subr.bf16.mxu0 %v2508_v0  ;;  %2388 = vmatprep.subr.bf16.mxu1 %v2508_v0  ;;  %v2510_v2 = vld [vmem:[%s3316_s0] sm:$0xff]   ;;  %v2512_v4 = vld [vmem:[%s3316_s0 + $0x8] sm:$0xff]   ;;  %v2513_v5 = vld [vmem:[%s3316_s0 + $0x98] sm:$0xff]  }
   0x3   :  { %2349 = vmatpush3.bf16.msra.mxu0 %v2508_v0  ;;  %2389 = vmatpush3.bf16.msra.mxu1 %v2508_v0  ;;  %v2514_v6 = vld [vmem:[%s3316_s0 + $0x10] sm:$0xff]   ;;  %v2515_v7 = vld [vmem:[%s3316_s0 + $0xa0] sm:$0xff]   ;;  %v2516_v8 = vld [vmem:[%s3316_s0 + $0x18] sm:$0xff]  }
   0x4   :  { %2350 = vmatprep.subr.bf16.mxu0 %v2509_v1  ;;  %2390 = vmatprep.subr.bf16.mxu1 %v2509_v1  ;;  %v2517_v9 = vld [vmem:[%s3316_s0 + $0xa8] sm:$0xff]   ;;  %v2518_v10 = vld [vmem:[%s3316_s0 + $0x20] sm:$0xff]   ;;  %v2519_v11 = vld [vmem:[%s3316_s0 + $0xb0] sm:$0xff]  }
   0x5   :  { %2352 = vmatprep.mubr.msk.bf16.mxu0 %vm157_vm0, %v2510_v2  ;;  %2392 = vmatprep.mubr.msk.bf16.mxu1 %vm157_vm0, %v2511_v3  ;;  %v2520_v12 = vld [vmem:[%s3316_s0 + $0x28] sm:$0xff]   ;;  %v2521_v13 = vld [vmem:[%s3316_s0 + $0xb8] sm:$0xff]   ;;  %v2522_v14 = vld [vmem:[%s3316_s0 + $0x30] sm:$0xff]  }
   0x6   :  { %v2523_v15 = vld [vmem:[%s3316_s0 + $0xc0] sm:$0xff]   ;;  %v2524_v16 = vld [vmem:[%s3316_s0 + $0x38] sm:$0xff]   ;;  %v2525_v17 = vld [vmem:[%s3316_s0 + $0xc8] sm:$0xff]  }
   0x7   :  { %2351 = vmatpush3.bf16.msra.mxu0 %v2509_v1  ;;  %2391 = vmatpush3.bf16.msra.mxu1 %v2509_v1  ;;  %v2526_v18 = vld [vmem:[%s3316_s0 + $0x40] sm:$0xff]   ;;  %v2527_v19 = vld [vmem:[%s3316_s0 + $0xd0] sm:$0xff]   ;;  %v2528_v20 = vld [vmem:[%s3316_s0 + $0x48] sm:$0xff]  }
   0x8   :  { %2428 = vmatprep.subr.bf16.mxu0 %v2508_v0  ;;  %2468 = vmatprep.subr.bf16.mxu1 %v2508_v0  ;;  %v2529_v21 = vld [vmem:[%s3316_s0 + $0xd8] sm:$0xff]   ;;  %v2530_v22 = vld [vmem:[%s3316_s0 + $0x50] sm:$0xff]   ;;  %v2531_v23 = vld [vmem:[%s3316_s0 + $0xe0] sm:$0xff]  }
   0x9   :  { %v2532_v24 = vld [vmem:[%s3316_s0 + $0x58] sm:$0xff]   ;;  %v2533_v25 = vld [vmem:[%s3316_s0 + $0xe8] sm:$0xff]   ;;  %v2534_v26 = vld [vmem:[%s3316_s0 + $0x60] sm:$0xff]  }
   0xa   :  { %2353 = vmatmul.mubr.msk.bf16.vlgmr.msra.gmra.mxu0 %vm157_vm0, %v2512_v4  ;;  %2393 = vmatmul.mubr.msk.bf16.vlgmr.msra.gmra.mxu1 %vm157_vm0, %v2513_v5  ;;  %v2535_v27 = vld [vmem:[%s3316_s0 + $0xf0] sm:$0xff]   ;;  %v2536_v28 = vld [vmem:[%s3316_s0 + $0x68] sm:$0xff]   ;;  %v2537_v29 = vld [vmem:[%s3316_s0 + $0xf8] sm:$0xff]  }
   0xb   :  { %2429 = vmatpush3.bf16.msra.mxu0 %v2508_v0  ;;  %2469 = vmatpush3.bf16.msra.mxu1 %v2508_v0  ;;  %v2538_v30 = vld [vmem:[%s3316_s0 + $0x70] sm:$0xff]   ;;  %v2539_v31 = vld [vmem:[%s3316_s0 + $0x100] sm:$0xff]   ;;  %v2540_v32 = vld [vmem:[%s3316_s0 + $0x78] sm:$0xff]  }
   0xc   :  { %2356 = vmatprep.mubr.msk.bf16.mxu0 %vm157_vm0, %v2514_v6  ;;  %2396 = vmatprep.mubr.msk.bf16.mxu1 %vm157_vm0, %v2515_v7  ;;  %v2541_v33 = vld [vmem:[%s3316_s0 + $0x108] sm:$0xff]   ;;  %v2542_v34 = vld [vmem:[%s3316_s0 + $0x80] sm:$0xff]   ;;  %v2543_v35 = vld [vmem:[%s3316_s0 + $0x110] sm:$0xff]  }
   0xd   :  { %2430 = vmatprep.subr.bf16.mxu0 %v2509_v1  ;;  %2470 = vmatprep.subr.bf16.mxu1 %v2509_v1  ;;  %v2544_v36 = vld [vmem:[%s3316_s0 + $0x88] sm:$0xff]   ;;  %v2545_v37 = vld [vmem:[%s3316_s0 + $0x118] sm:$0xff]   ;;  %v2546_v38 = vld [vmem:[%s3316_s0 + $0x120] sm:$0xff]  }
   0xe   :  { %v2547_v39 = vld [vmem:[%s3316_s0 + $0x1b0] sm:$0xff]   ;;  %v2548_v40 = vld [vmem:[%s3316_s0 + $0x128] sm:$0xff]   ;;  %v2549_v41 = vld [vmem:[%s3316_s0 + $0x1b8] sm:$0xff]  }
   0xf   :  { %2431 = vmatpush3.bf16.msra.mxu0 %v2509_v1  ;;  %2471 = vmatpush3.bf16.msra.mxu1 %v2509_v1  ;;  %v2550_v42 = vld [vmem:[%s3316_s0 + $0x130] sm:$0xff]   ;;  %v2551_v43 = vld [vmem:[%s3316_s0 + $0x1c0] sm:$0xff]   ;;  %v2552_v44 = vld [vmem:[%s3316_s0 + $0x138] sm:$0xff]  }
  0x10   :  { %v2553_v45 = vld [vmem:[%s3316_s0 + $0x1c8] sm:$0xff]   ;;  %v2554_v46 = vld [vmem:[%s3316_s0 + $0x140] sm:$0xff]   ;;  %v2555_v47 = vld [vmem:[%s3316_s0 + $0x1d0] sm:$0xff]  }
  0x11   :  { %v2556_v48 = vld [vmem:[%s3316_s0 + $0x148] sm:$0xff]   ;;  %v2557_v49 = vld [vmem:[%s3316_s0 + $0x1d8] sm:$0xff]   ;;  %v2558_v50 = vld [vmem:[%s3316_s0 + $0x150] sm:$0xff]  }
  0x12   :  { %2357 = vmatmul.mubr.msk.bf16.gmra.mxu0 %vm157_vm0, %v2516_v8  ;;  %2397 = vmatmul.mubr.msk.bf16.gmra.mxu1 %vm157_vm0, %v2517_v9  ;;  %v2559_v51 = vld [vmem:[%s3316_s0 + $0x1e0] sm:$0xff]   ;;  %v2560_v52 = vld [vmem:[%s3316_s0 + $0x158] sm:$0xff]   ;;  %v2561_v53 = vld [vmem:[%s3316_s0 + $0x1e8] sm:$0xff]  }
  0x13   :  { %2360 = vmatprep.mubr.msk.bf16.mxu0 %vm157_vm0, %v2518_v10  ;;  %2400 = vmatprep.mubr.msk.bf16.mxu1 %vm157_vm0, %v2519_v11  ;;  %v2562_v54 = vld [vmem:[%s3316_s0 + $0x160] sm:$0xff]   ;;  %v2563_v55 = vld [vmem:[%s3316_s0 + $0x1f0] sm:$0xff]   ;;  %v2564_v56 = vld [vmem:[%s3316_s0 + $0x168] sm:$0xff]  }
  0x14   :  { %v2565_v57 = vld [vmem:[%s3316_s0 + $0x1f8] sm:$0xff]   ;;  %v2566_v58 = vld [vmem:[%s3316_s0 + $0x170] sm:$0xff]   ;;  %v2567_v59 = vld [vmem:[%s3316_s0 + $0x200] sm:$0xff]  }
  0x15   :  { %v2568_v60 = vld [vmem:[%s3316_s0 + $0x178] sm:$0xff]   ;;  %v2569_v61 = vld [vmem:[%s3316_s0 + $0x208] sm:$0xff]   ;;  %v2570_v62 = vld [vmem:[%s3316_s0 + $0x180] sm:$0xff]  }
  0x16   :  { %v2571_v63 = vld [vmem:[%s3316_s0 + $0x210] sm:$0xff]   ;;  %v2572_v0 = vld [vmem:[%s3316_s0 + $0x188] sm:$0xff]   ;;  %v2573_v1 = vld [vmem:[%s3316_s0 + $0x218] sm:$0xff]  }
  0x17   :  { %v2574_v2 = vld [vmem:[%s3316_s0 + $0x190] sm:$0xff]   ;;  %v2575_v3 = vld [vmem:[%s3316_s0 + $0x220] sm:$0xff]   ;;  %v2576_v4 = vld [vmem:[%s3316_s0 + $0x198] sm:$0xff]  }
  0x18   :  { %v2577_v5 = vld [vmem:[%s3316_s0 + $0x228] sm:$0xff]   ;;  %v2578_v6 = vld [vmem:[%s3316_s0 + $0x1a0] sm:$0xff]   ;;  %v2579_v7 = vld [vmem:[%s3316_s0 + $0x230] sm:$0xff]  }
  0x19   :  { %v2580_v8 = vld [vmem:[%s3316_s0 + $0x1a8] sm:$0xff]   ;;  %v2581_v9 = vld [vmem:[%s3316_s0 + $0x238] sm:$0xff]  }
  0x1a   :  { %2361 = vmatmul.mubr.msk.bf16.gmra.mxu0 %vm157_vm0, %v2520_v12  ;;  %2401 = vmatmul.mubr.msk.bf16.gmra.mxu1 %vm157_vm0, %v2521_v13 }
  0x1b   :  { %2364 = vmatprep.mubr.msk.bf16.mxu0 %vm157_vm0, %v2522_v14  ;;  %2404 = vmatprep.mubr.msk.bf16.mxu1 %vm157_vm0, %v2523_v15 }
  0x22   :  { %2365 = vmatmul.mubr.msk.bf16.gmra.mxu0 %vm157_vm0, %v2524_v16  ;;  %2405 = vmatmul.mubr.msk.bf16.gmra.mxu1 %vm157_vm0, %v2525_v17 }
  0x23   :  { %2368 = vmatprep.mubr.msk.bf16.mxu0 %vm157_vm0, %v2526_v18  ;;  %2408 = vmatprep.mubr.msk.bf16.mxu1 %vm157_vm0, %v2527_v19 }
  0x2a   :  { %2369 = vmatmul.mubr.msk.bf16.gmra.mxu0 %vm157_vm0, %v2528_v20  ;;  %2409 = vmatmul.mubr.msk.bf16.gmra.mxu1 %vm157_vm0, %v2529_v21 }
  0x2b   :  { %2372 = vmatprep.mubr.msk.bf16.mxu0 %vm157_vm0, %v2530_v22  ;;  %2412 = vmatprep.mubr.msk.bf16.mxu1 %vm157_vm0, %v2531_v23 }
  0x32   :  { %2373 = vmatmul.mubr.msk.bf16.gmra.mxu0 %vm157_vm0, %v2532_v24  ;;  %2413 = vmatmul.mubr.msk.bf16.gmra.mxu1 %vm157_vm0, %v2533_v25 }
  0x33   :  { %2376 = vmatprep.mubr.msk.bf16.mxu0 %vm157_vm0, %v2534_v26  ;;  %2416 = vmatprep.mubr.msk.bf16.mxu1 %vm157_vm0, %v2535_v27 }
  0x3a   :  { %2377 = vmatmul.mubr.msk.bf16.gmra.mxu0 %vm157_vm0, %v2536_v28  ;;  %2417 = vmatmul.mubr.msk.bf16.gmra.mxu1 %vm157_vm0, %v2537_v29 }
  0x3b   :  { %2380 = vmatprep.mubr.msk.bf16.mxu0 %vm157_vm0, %v2538_v30  ;;  %2420 = vmatprep.mubr.msk.bf16.mxu1 %vm157_vm0, %v2539_v31 }
  0x42   :  { %2381 = vmatmul.mubr.msk.bf16.gmra.mxu0 %vm157_vm0, %v2540_v32  ;;  %2421 = vmatmul.mubr.msk.bf16.gmra.mxu1 %vm157_vm0, %v2541_v33 }
  0x43   :  { %2384 = vmatprep.mubr.msk.bf16.mxu0 %vm157_vm0, %v2542_v34  ;;  %2424 = vmatprep.mubr.msk.bf16.mxu1 %vm157_vm0, %v2543_v35 }
  0x4a   :  { %2385 = vmatmul.mubr.msk.bf16.gmra.mxu0 %vm157_vm0, %v2544_v36  ;;  %2425 = vmatmul.mubr.msk.bf16.gmra.mxu1 %vm157_vm0, %v2545_v37 }
  0x4b   :  { %2432 = vmatprep.mubr.msk.bf16.mxu0 %vm157_vm0, %v2546_v38  ;;  %2472 = vmatprep.mubr.msk.bf16.mxu1 %vm157_vm0, %v2547_v39 }
  0x52   :  { %2433 = vmatmul.mubr.msk.bf16.vlgmr.msra.gmra.mxu0 %vm157_vm0, %v2548_v40  ;;  %2473 = vmatmul.mubr.msk.bf16.vlgmr.msra.gmra.mxu1 %vm157_vm0, %v2549_v41 }
  0x53   :  { %2436 = vmatprep.mubr.msk.bf16.mxu0 %vm157_vm0, %v2550_v42  ;;  %2476 = vmatprep.mubr.msk.bf16.mxu1 %vm157_vm0, %v2551_v43 }
  0x5a   :  { %2437 = vmatmul.mubr.msk.bf16.gmra.mxu0 %vm157_vm0, %v2552_v44  ;;  %2477 = vmatmul.mubr.msk.bf16.gmra.mxu1 %vm157_vm0, %v2553_v45 }
  0x5b   :  { %2440 = vmatprep.mubr.msk.bf16.mxu0 %vm157_vm0, %v2554_v46  ;;  %2480 = vmatprep.mubr.msk.bf16.mxu1 %vm157_vm0, %v2555_v47 }
  0x62   :  { %2441 = vmatmul.mubr.msk.bf16.gmra.mxu0 %vm157_vm0, %v2556_v48  ;;  %2481 = vmatmul.mubr.msk.bf16.gmra.mxu1 %vm157_vm0, %v2557_v49 }
  0x63   :  { %2444 = vmatprep.mubr.msk.bf16.mxu0 %vm157_vm0, %v2558_v50  ;;  %2484 = vmatprep.mubr.msk.bf16.mxu1 %vm157_vm0, %v2559_v51 }
  0x6a   :  { %2445 = vmatmul.mubr.msk.bf16.gmra.mxu0 %vm157_vm0, %v2560_v52  ;;  %2485 = vmatmul.mubr.msk.bf16.gmra.mxu1 %vm157_vm0, %v2561_v53 }
  0x6b   :  { %2448 = vmatprep.mubr.msk.bf16.mxu0 %vm157_vm0, %v2562_v54  ;;  %2488 = vmatprep.mubr.msk.bf16.mxu1 %vm157_vm0, %v2563_v55 }
  0x72   :  { %2449 = vmatmul.mubr.msk.bf16.gmra.mxu0 %vm157_vm0, %v2564_v56  ;;  %2489 = vmatmul.mubr.msk.bf16.gmra.mxu1 %vm157_vm0, %v2565_v57 }
  0x73   :  { %2452 = vmatprep.mubr.msk.bf16.mxu0 %vm157_vm0, %v2566_v58  ;;  %2492 = vmatprep.mubr.msk.bf16.mxu1 %vm157_vm0, %v2567_v59 }
  0x7a   :  { %2453 = vmatmul.mubr.msk.bf16.gmra.mxu0 %vm157_vm0, %v2568_v60  ;;  %2493 = vmatmul.mubr.msk.bf16.gmra.mxu1 %vm157_vm0, %v2569_v61 }
  0x7b   :  { %2456 = vmatprep.mubr.msk.bf16.mxu0 %vm157_vm0, %v2570_v62  ;;  %2496 = vmatprep.mubr.msk.bf16.mxu1 %vm157_vm0, %v2571_v63 }
  0x82   :  { %2457 = vmatmul.mubr.msk.bf16.gmra.mxu0 %vm157_vm0, %v2572_v0  ;;  %2497 = vmatmul.mubr.msk.bf16.gmra.mxu1 %vm157_vm0, %v2573_v1 }
  0x83   :  { %2460 = vmatprep.mubr.msk.bf16.mxu0 %vm157_vm0, %v2574_v2  ;;  %2500 = vmatprep.mubr.msk.bf16.mxu1 %vm157_vm0, %v2575_v3 }
  0x8a   :  { %2461 = vmatmul.mubr.msk.bf16.gmra.mxu0 %vm157_vm0, %v2576_v4  ;;  %2501 = vmatmul.mubr.msk.bf16.gmra.mxu1 %vm157_vm0, %v2577_v5 }
  0x8b   :  { %2464 = vmatprep.mubr.msk.bf16.mxu0 %vm157_vm0, %v2578_v6  ;;  %2504 = vmatprep.mubr.msk.bf16.mxu1 %vm157_vm0, %v2579_v7 }
  0x92   :  { %2465 = vmatmul.mubr.msk.bf16.gmra.mxu0 %vm157_vm0, %v2580_v8  ;;  %2505 = vmatmul.mubr.msk.bf16.gmra.mxu1 %vm157_vm0, %v2581_v9 }
  0xca   :  { %v2896_v10 = vpop.f32.mrf.mxu0  ;;  %v2898_v11 = vpop.f32.mrf.mxu1 }
  0xcc   :  { %v2902_v13 = vpop.f32.mrf.mxu0  ;;  %v2904_v14 = vpop.f32.mrf.mxu1 }
  0xce   :  { %v2908_v16 = vpop.f32.mrf.mxu0  ;;  %v2910_v17 = vpop.f32.mrf.mxu1 }
  0xd0   :  { %v2914_v19 = vpop.f32.mrf.mxu0  ;;  %v2916_v20 = vpop.f32.mrf.mxu1 }
  0xd2   :  { %v2920_v22 = vpop.f32.mrf.mxu0  ;;  %v2922_v23 = vpop.f32.mrf.mxu1 }
  0xd4   :  { %v2926_v25 = vpop.f32.mrf.mxu0  ;;  %v2928_v26 = vpop.f32.mrf.mxu1 }
  0xd6   :  { %v2932_v28 = vpop.f32.mrf.mxu0  ;;  %v2934_v29 = vpop.f32.mrf.mxu1 }
  0xd8   :  { %v2938_v31 = vpop.f32.mrf.mxu0  ;;  %v2940_v32 = vpop.f32.mrf.mxu1 }
  0xda   :  { %v2944_v34 = vpop.f32.mrf.mxu0  ;;  %v2946_v35 = vpop.f32.mrf.mxu1 }
  0xdc   :  { %v2950_v37 = vpop.f32.mrf.mxu0  ;;  %v2952_v38 = vpop.f32.mrf.mxu1 }
  0xde   :  { %v2956_v40 = vpop.f32.mrf.mxu0  ;;  %v2958_v41 = vpop.f32.mrf.mxu1 }
  0xe0   :  { %v2962_v43 = vpop.f32.mrf.mxu0  ;;  %v2964_v44 = vpop.f32.mrf.mxu1 }
  0xe2   :  { %v2968_v46 = vpop.f32.mrf.mxu0  ;;  %v2970_v47 = vpop.f32.mrf.mxu1 }
  0xe4   :  { %v2974_v49 = vpop.f32.mrf.mxu0  ;;  %v2976_v50 = vpop.f32.mrf.mxu1 }
  0xe6   :  { %v2980_v52 = vpop.f32.mrf.mxu0  ;;  %v2982_v53 = vpop.f32.mrf.mxu1 }
  0xe8   :  { %v2986_v55 = vpop.f32.mrf.mxu0  ;;  %v2988_v56 = vpop.f32.mrf.mxu1 }
  0xea   :  { %v2992_v58 = vpop.f32.mrf.mxu0  ;;  %v2994_v59 = vpop.f32.mrf.mxu1 }
  0xec   :  { %v2998_v61 = vpop.f32.mrf.mxu0  ;;  %v3000_v62 = vpop.f32.mrf.mxu1 }
  0xee   :  { %v3004_v0 = vpop.f32.mrf.mxu0  ;;  %v3006_v1 = vpop.f32.mrf.mxu1 }
  0xf0   :  { %v3010_v3 = vpop.f32.mrf.mxu0  ;;  %v3012_v4 = vpop.f32.mrf.mxu1 }
  0xf2   :  { %v3016_v6 = vpop.f32.mrf.mxu0  ;;  %v3018_v7 = vpop.f32.mrf.mxu1 }
  0xf4   :  { %v3022_v9 = vpop.f32.mrf.mxu0  ;;  %v3024_v63 = vpop.f32.mrf.mxu1 }
  0xf6   :  { %v3028_v60 = vpop.f32.mrf.mxu0  ;;  %v3030_v57 = vpop.f32.mrf.mxu1 }
  0xf8   :  { %v3034_v54 = vpop.f32.mrf.mxu0  ;;  %v3036_v51 = vpop.f32.mrf.mxu1 }
  0xfa   :  { %v3040_v48 = vpop.f32.mrf.mxu0  ;;  %v3042_v45 = vpop.f32.mrf.mxu1 }
  0xfb   :  { %3342 = vst [vmem:[#allocation2_spill] sm:$0xff] %v3042_v45 }
  0xfc   :  { %v3046_v42 = vpop.f32.mrf.mxu0  ;;  %v3048_v39 = vpop.f32.mrf.mxu1 }
  0xfd   :  { %3343 = vst [vmem:[#allocation3_spill] sm:$0xff] %v3046_v42  ;;  %3344 = vst [vmem:[#allocation4_spill] sm:$0xff] %v3048_v39  ;;  %v3366_v42 = vmax.f32 %v2902_v13, %v2904_v14  ;;  %v3368_v13 = vmax.f32 %v2914_v19, %v2916_v20  ;;  %v3370_v19 = vmax.f32 %v2926_v25, %v2928_v26 }
  0xfe   :  { %v3052_v36 = vpop.f32.mrf.mxu0  ;;  %v3054_v33 = vpop.f32.mrf.mxu1  ;;  %v3372_v25 = vmax.f32 %v2938_v31, %v2940_v32 }
  0xff   :  { %3345 = vst [vmem:[#allocation5_spill] sm:$0xff] %v3052_v36  ;;  %3346 = vst [vmem:[#allocation6_spill] sm:$0xff] %v3054_v33  ;;  %v3365_v36 = vmax.f32 %v2896_v10, %v2898_v11 }
 0x100   :  { %v3058_v30 = vpop.f32.mrf.mxu0  ;;  %v3060_v27 = vpop.f32.mrf.mxu1 }
 0x101   :  { %3347 = vst [vmem:[#allocation7_spill] sm:$0xff] %v3058_v30  ;;  %3348 = vst [vmem:[#allocation8_spill] sm:$0xff] %v3060_v27 }
 0x102   :  { %v3064_v24 = vpop.f32.mrf.mxu0  ;;  %v3066_v21 = vpop.f32.mrf.mxu1 }
 0x103   :  { %3349 = vst [vmem:[#allocation9_spill] sm:$0xff] %v3064_v24  ;;  %3350 = vst [vmem:[#allocation10_spill] sm:$0xff] %v3066_v21 }
 0x104   :  { %v3070_v18 = vpop.f32.mrf.mxu0  ;;  %v3072_v15 = vpop.f32.mrf.mxu1 }
 0x105   :  { %3351 = vst [vmem:[#allocation11_spill] sm:$0xff] %v3070_v18  ;;  %3352 = vst [vmem:[#allocation12_spill] sm:$0xff] %v3072_v15 }
 0x106   :  { %v3076_v12 = vpop.f32.mrf.mxu0  ;;  %v3078_v33 = vpop.f32.mrf.mxu1 }
 0x107   :  { %3353 = vst [vmem:[#allocation13_spill] sm:$0xff] %v3076_v12  ;;  %3354 = vst [vmem:[#allocation14_spill] sm:$0xff] %v3078_v33 }
 0x108   :  { %v3082_v27 = vpop.f32.mrf.mxu0  ;;  %v3084_v30 = vpop.f32.mrf.mxu1 }
 0x109   :  { %3355 = vst [vmem:[#allocation15_spill] sm:$0xff] %v3082_v27  ;;  %3356 = vst [vmem:[#allocation16_spill] sm:$0xff] %v3084_v30 }
 0x10a   :  { %v3088_v21 = vpop.f32.mrf.mxu0  ;;  %v3090_v24 = vpop.f32.mrf.mxu1 }
 0x10b   :  { %3357 = vst [vmem:[#allocation17_spill] sm:$0xff] %v3088_v21  ;;  %3358 = vst [vmem:[#allocation18_spill] sm:$0xff] %v3090_v24 }
 0x10c   :  { %v3094_v15 = vpop.f32.mrf.mxu0  ;;  %v3096_v18 = vpop.f32.mrf.mxu1 }
 0x10d   :  { %3359 = vst [vmem:[#allocation19_spill] sm:$0xff] %v3094_v15  ;;  %3360 = vst [vmem:[#allocation20_spill] sm:$0xff] %v3096_v18 }
 0x10e   :  { %v3100_v33 = vpop.f32.mrf.mxu0  ;;  %v3102_v12 = vpop.f32.mrf.mxu1 }
 0x10f   :  { %3361 = vst [vmem:[#allocation21_spill] sm:$0xff] %v3100_v33  ;;  %3362 = vst [vmem:[#allocation22_spill] sm:$0xff] %v3102_v12  ;;  %v3121_v12 = vld [vmem:[%s3317_s2] ss:$0 sm:$0xff] }
 0x110   :  { %v3106_v30 = vpop.f32.mrf.mxu0  ;;  %v3108_v27 = vpop.f32.mrf.mxu1 }
 0x111   :  { %3363 = vst [vmem:[#allocation23_spill] sm:$0xff] %v3106_v30  ;;  %3364 = vst [vmem:[#allocation24_spill] sm:$0xff] %v3108_v27  ;;  %v3367_v30 = vmax.f32 %v2908_v16, %v2910_v17  ;;  %v3369_v16 = vmax.f32 %v2920_v22, %v2922_v23  ;;  %v3371_v22 = vmax.f32 %v2932_v28, %v2934_v29 }
 0x112   :  { %v2434_v24 = vpop.f32.mrf.mxu0  ;;  %v2474_v21 = vpop.f32.mrf.mxu1 }
 0x113   :  { %v1143_v2 = vmax.f32 %v3365_v36, %v2434_v24 }
 0x114   :  { %v998_v18 = vpop.f32.mrf.mxu0  ;;  %v1392_v15 = vpop.f32.mrf.mxu1 }
 0x115   :  { %v1537_v39 = vmax.f32 %v1143_v2, %v2474_v21  ;;  %v1141_v5 = vmax.f32 %v3366_v42, %v998_v18 }
 0x116   :  { %v2435_v33 = vpop.f32.mrf.mxu0  ;;  %v2475_v8 = vpop.f32.mrf.mxu1 }
 0x117   :  { %v1535_v27 = vmax.f32 %v1141_v5, %v1392_v15  ;;  %v1144_v10 = vmax.f32 %v3367_v30, %v2435_v33  ;;  %v1580_v21 = vadd.f32 %v3121_v12, %v1537_v39 }
 0x118   :  { %v1001_v11 = vpop.f32.mrf.mxu0  ;;  %v1395_v24 = vpop.f32.mrf.mxu1 }
 0x119   :  { %v1538_v36 = vmax.f32 %v1144_v10, %v2475_v8  ;;  %v1142_v14 = vmax.f32 %v3368_v13, %v1001_v11  ;;  %v1578_v2 = vadd.f32 %v3121_v12, %v1535_v27  ;;  %v1616_v5 = vmax.f32 %v1580_v21, 0.0 }
 0x11a   :  { %v2438_v18 = vpop.f32.mrf.mxu0  ;;  %v2478_v42 = vpop.f32.mrf.mxu1 }
 0x11b   :  { %v1581_v45 = vadd.f32 %v3121_v12, %v1538_v36  ;;  %v1536_v15 = vmax.f32 %v1142_v14, %v1395_v24  ;;  %v1147_v17 = vmax.f32 %v3369_v16, %v2438_v18  ;;  %v1614_v13 = vmax.f32 %v1578_v2, 0.0 }
 0x11c   :  { %v1014_v30 = vpop.f32.mrf.mxu0  ;;  %v1408_v33 = vpop.f32.mrf.mxu1 }
 0x11d   :  { %v1617_v39 = vmax.f32 %v1581_v45, 0.0  ;;  %v1579_v8 = vadd.f32 %v3121_v12, %v1536_v15  ;;  %v1145_v20 = vmax.f32 %v3370_v19, %v1014_v30  ;;  %v1541_v10 = vmax.f32 %v1147_v17, %v2478_v42 }
 0x11e   :  { %v2439_v11 = vpop.f32.mrf.mxu0  ;;  %v2479_v27 = vpop.f32.mrf.mxu1  ;;  %v3373_v17 = vmax.f32 %v2944_v34, %v2946_v35  ;;  %v3375_v34 = vmax.f32 %v2956_v40, %v2958_v41  ;;  %v3377_v41 = vmax.f32 %v2968_v46, %v2970_v47  ;;  %v3379_v46 = vmax.f32 %v2980_v52, %v2982_v53 }
 0x11f   :  { %v2169_v36 = vpack.c.bf16 %v1617_v39, %v1616_v5  ;;  %v1615_v24 = vmax.f32 %v1579_v8, 0.0  ;;  %v1539_v14 = vmax.f32 %v1145_v20, %v1408_v33  ;;  %v1148_v23 = vmax.f32 %v3371_v22, %v2439_v11 }
 0x120   :  { %v1017_v18 = vpop.f32.mrf.mxu0  ;;  %v1411_v21 = vpop.f32.mrf.mxu1  ;;  %v1584_v42 = vadd.f32 %v3121_v12, %v1541_v10  ;;  %v3374_v8 = vmax.f32 %v2950_v37, %v2952_v38  ;;  %v3376_v37 = vmax.f32 %v2962_v43, %v2964_v44 }
 0x121   :  { %2251 = vst [vmem:[%s3318_s3 + $0x8] sm:$0xff] %v2169_v36   ;;  %v2164_v45 = vpack.c.bf16 %v1615_v24, %v1614_v13  ;;  %v1146_v26 = vmax.f32 %v3372_v25, %v1017_v18  ;;  %v1542_v2 = vmax.f32 %v1148_v23, %v2479_v27  ;;  %v1582_v28 = vadd.f32 %v3121_v12, %v1539_v14 }
 0x122   :  { %v2442_v15 = vpop.f32.mrf.mxu0  ;;  %v2482_v16 = vpop.f32.mrf.mxu1  ;;  %v1620_v20 = vmax.f32 %v1584_v42, 0.0 }
 0x123   :  { %2165 = vst [vmem:[%s3318_s3] sm:$0xff] %v2164_v45   ;;  %v1540_v29 = vmax.f32 %v1146_v26, %v1411_v21  ;;  %v1151_v30 = vmax.f32 %v3373_v17, %v2442_v15  ;;  %v1585_v33 = vadd.f32 %v3121_v12, %v1542_v2  ;;  %v1618_v13 = vmax.f32 %v1582_v28, 0.0 }
 0x124   :  { %v1030_v31 = vpop.f32.mrf.mxu0  ;;  %v1424_v32 = vpop.f32.mrf.mxu1  ;;  %v3378_v17 = vmax.f32 %v2974_v49, %v2976_v50 }
 0x125   :  { %v1583_v5 = vadd.f32 %v3121_v12, %v1540_v29  ;;  %v1545_v39 = vmax.f32 %v1151_v30, %v2482_v16  ;;  %v1149_v19 = vmax.f32 %v3374_v8, %v1030_v31  ;;  %v1621_v10 = vmax.f32 %v1585_v33, 0.0 }
 0x126   :  { %v2443_v11 = vpop.f32.mrf.mxu0  ;;  %v2483_v27 = vpop.f32.mrf.mxu1 }
 0x127   :  { %v1619_v36 = vmax.f32 %v1583_v5, 0.0  ;;  %v1152_v35 = vmax.f32 %v3375_v34, %v2443_v11  ;;  %v2179_v24 = vpack.c.bf16 %v1621_v10, %v1620_v20  ;;  %v1543_v14 = vmax.f32 %v1149_v19, %v1424_v32 }
 0x128   :  { %v1033_v22 = vpop.f32.mrf.mxu0  ;;  %v1427_v23 = vpop.f32.mrf.mxu1  ;;  %v1588_v21 = vadd.f32 %v3121_v12, %v1545_v39  ;;  %v3380_v11 = vmax.f32 %v2986_v55, %v2988_v56 }
 0x129   :  { %v2174_v18 = vpack.c.bf16 %v1619_v36, %v1618_v13  ;;  %v1546_v45 = vmax.f32 %v1152_v35, %v2483_v27  ;;  %2253 = vst [vmem:[%s3318_s3 + $0x18] sm:$0xff] %v2179_v24   ;;  %v1150_v38 = vmax.f32 %v3376_v37, %v1033_v22  ;;  %v1586_v2 = vadd.f32 %v3121_v12, %v1543_v14 }
 0x12a   :  { %v2446_v25 = vpop.f32.mrf.mxu0  ;;  %v2486_v26 = vpop.f32.mrf.mxu1  ;;  %v1624_v29 = vmax.f32 %v1588_v21, 0.0  ;;  %v3381_v24 = vmax.f32 %v2992_v58, %v2994_v59  ;;  %v3382_v21 = vmax.f32 %v2998_v61, %v3000_v62  ;;  %v3384_v61 = vmax.f32 %v3010_v3, %v3012_v4 }
 0x12b   :  { %2252 = vst [vmem:[%s3318_s3 + $0x10] sm:$0xff] %v2174_v18   ;;  %v1589_v40 = vadd.f32 %v3121_v12, %v1546_v45  ;;  %v1155_v42 = vmax.f32 %v3377_v41, %v2446_v25  ;;  %v1544_v15 = vmax.f32 %v1150_v38, %v1427_v23  ;;  %v1622_v8 = vmax.f32 %v1586_v2, 0.0 }
 0x12c   :  { %v1046_v16 = vpop.f32.mrf.mxu0  ;;  %v1440_v28 = vpop.f32.mrf.mxu1  ;;  %v3383_v41 = vmax.f32 %v3004_v0, %v3006_v1 }
 0x12d   :  { %v1625_v43 = vmax.f32 %v1589_v40, 0.0  ;;  %v1549_v44 = vmax.f32 %v1155_v42, %v2486_v26  ;;  %v1153_v30 = vmax.f32 %v3378_v17, %v1046_v16  ;;  %v1587_v33 = vadd.f32 %v3121_v12, %v1544_v15 }
 0x12e   :  { %v2447_v31 = vpop.f32.mrf.mxu0  ;;  %v2487_v32 = vpop.f32.mrf.mxu1  ;;  %v3385_v17 = vmax.f32 %v3016_v6, %v3018_v7  ;;  %v3387_v6 = vmax.f32 %v3028_v60, %v3030_v57  ;;  %v3389_v60 = vld [vmem:[#allocation2_spill] sm:$0xff] }
 0x12f   :  { %v2189_v5 = vpack.c.bf16 %v1625_v43, %v1624_v29  ;;  %v1547_v39 = vmax.f32 %v1153_v30, %v1440_v28  ;;  %v1156_v47 = vmax.f32 %v3379_v46, %v2447_v31  ;;  %v1623_v19 = vmax.f32 %v1587_v33, 0.0 }
 0x130   :  { %v1049_v20 = vpop.f32.mrf.mxu0  ;;  %v1443_v10 = vpop.f32.mrf.mxu1  ;;  %v1592_v49 = vadd.f32 %v3121_v12, %v1549_v44 }
 0x131   :  { %2255 = vst [vmem:[%s3318_s3 + $0x28] sm:$0xff] %v2189_v5   ;;  %v1550_v50 = vmax.f32 %v1156_v47, %v2487_v32  ;;  %v1154_v27 = vmax.f32 %v3380_v11, %v1049_v20  ;;  %v2184_v13 = vpack.c.bf16 %v1623_v19, %v1622_v8  ;;  %v1590_v52 = vadd.f32 %v3121_v12, %v1547_v39 }
 0x132   :  { %v2450_v36 = vpop.f32.mrf.mxu0  ;;  %v2490_v34 = vpop.f32.mrf.mxu1  ;;  %v1628_v55 = vmax.f32 %v1592_v49, 0.0  ;;  %v3386_v5 = vmax.f32 %v3022_v9, %v3024_v63  ;;  %v3388_v63 = vmax.f32 %v3034_v54, %v3036_v51 }
 0x133   :  { %v1593_v53 = vadd.f32 %v3121_v12, %v1550_v50  ;;  %v1548_v35 = vmax.f32 %v1154_v27, %v1443_v10  ;;  %v1159_v14 = vmax.f32 %v3381_v24, %v2450_v36  ;;  %2254 = vst [vmem:[%s3318_s3 + $0x20] sm:$0xff] %v2184_v13   ;;  %v1626_v26 = vmax.f32 %v1590_v52, 0.0 }
 0x134   :  { %v1062_v22 = vpop.f32.mrf.mxu0  ;;  %v1456_v23 = vpop.f32.mrf.mxu1 }
 0x135   :  { %v1629_v56 = vmax.f32 %v1593_v53, 0.0  ;;  %v1591_v18 = vadd.f32 %v3121_v12, %v1548_v35  ;;  %v1157_v45 = vmax.f32 %v3382_v21, %v1062_v22  ;;  %v1553_v37 = vmax.f32 %v1159_v14, %v2490_v34  ;;  %v3392_v21 = vld [vmem:[#allocation4_spill] sm:$0xff] }
 0x136   :  { %v2451_v38 = vpop.f32.mrf.mxu0  ;;  %v2491_v25 = vpop.f32.mrf.mxu1  ;;  %v3390_v35 = vmax.f32 %v3040_v48, %v3389_v60  ;;  %v3394_v48 = vld [vmem:[#allocation5_spill] sm:$0xff] }
 0x137   :  { %v2199_v58 = vpack.c.bf16 %v1629_v56, %v1628_v55  ;;  %v1627_v59 = vmax.f32 %v1591_v18, 0.0  ;;  %v1551_v40 = vmax.f32 %v1157_v45, %v1456_v23  ;;  %v1160_v42 = vmax.f32 %v3383_v41, %v2451_v38  ;;  %v3391_v18 = vld [vmem:[#allocation3_spill] sm:$0xff] }
 0x138   :  { %v1065_v2 = vpop.f32.mrf.mxu0  ;;  %v1459_v15 = vpop.f32.mrf.mxu1  ;;  %v1596_v28 = vadd.f32 %v3121_v12, %v1553_v37  ;;  %v3393_v45 = vmax.f32 %v3391_v18, %v3392_v21 }
 0x139   :  { %2257 = vst [vmem:[%s3318_s3 + $0x38] sm:$0xff] %v2199_v58   ;;  %v2194_v16 = vpack.c.bf16 %v1627_v59, %v1626_v26  ;;  %v1158_v62 = vmax.f32 %v3384_v61, %v1065_v2  ;;  %v1554_v29 = vmax.f32 %v1160_v42, %v2491_v25  ;;  %v1594_v0 = vadd.f32 %v3121_v12, %v1551_v40  ;;  %v3395_v40 = vld [vmem:[#allocation6_spill] sm:$0xff] }
 0x13a   :  { %v2454_v43 = vpop.f32.mrf.mxu0  ;;  %v2494_v44 = vpop.f32.mrf.mxu1  ;;  %v1632_v46 = vmax.f32 %v1596_v28, 0.0  ;;  %v3396_v41 = vmax.f32 %v3394_v48, %v3395_v40 }
 0x13b   :  { %2256 = vst [vmem:[%s3318_s3 + $0x30] sm:$0xff] %v2194_v16   ;;  %v1552_v1 = vmax.f32 %v1158_v62, %v1459_v15  ;;  %v1163_v30 = vmax.f32 %v3385_v17, %v2454_v43  ;;  %v1597_v33 = vadd.f32 %v3121_v12, %v1554_v29  ;;  %v1630_v20 = vmax.f32 %v1594_v0, 0.0  ;;  %v3397_v29 = vld [vmem:[#allocation7_spill] sm:$0xff]  ;;  %v3398_v43 = vld [vmem:[#allocation8_spill] sm:$0xff] }
 0x13c   :  { %v1078_v3 = vpop.f32.mrf.mxu0  ;;  %v1472_v4 = vpop.f32.mrf.mxu1 }
 0x13d   :  { %v1595_v31 = vadd.f32 %v3121_v12, %v1552_v1  ;;  %v1557_v32 = vmax.f32 %v1163_v30, %v2494_v44  ;;  %v1161_v39 = vmax.f32 %v3386_v5, %v1078_v3  ;;  %v1633_v47 = vmax.f32 %v1597_v33, 0.0 }
 0x13e   :  { %v2455_v8 = vpop.f32.mrf.mxu0  ;;  %v2495_v19 = vpop.f32.mrf.mxu1  ;;  %v3399_v44 = vmax.f32 %v3397_v29, %v3398_v43 }
 0x13f   :  { %v1631_v10 = vmax.f32 %v1595_v31, 0.0  ;;  %v1164_v7 = vmax.f32 %v3387_v6, %v2455_v8  ;;  %v2209_v49 = vpack.c.bf16 %v1633_v47, %v1632_v46  ;;  %v1555_v50 = vmax.f32 %v1161_v39, %v1472_v4  ;;  %v3400_v31 = vld [vmem:[#allocation9_spill] sm:$0xff]  ;;  %v3404_v6 = vld [vmem:[#allocation12_spill] sm:$0xff] }
 0x140   :  { %v1081_v11 = vpop.f32.mrf.mxu0  ;;  %v1475_v27 = vpop.f32.mrf.mxu1  ;;  %v1600_v36 = vadd.f32 %v3121_v12, %v1557_v32  ;;  %v3401_v32 = vld [vmem:[#allocation10_spill] sm:$0xff] }
 0x141   :  { %v2204_v13 = vpack.c.bf16 %v1631_v10, %v1630_v20  ;;  %v1558_v34 = vmax.f32 %v1164_v7, %v2495_v19  ;;  %2259 = vst [vmem:[%s3318_s3 + $0x48] sm:$0xff] %v2209_v49   ;;  %v1162_v9 = vmax.f32 %v3388_v63, %v1081_v11  ;;  %v1598_v14 = vadd.f32 %v3121_v12, %v1555_v50  ;;  %v3403_v10 = vld [vmem:[#allocation11_spill] sm:$0xff] }
 0x142   :  { %v2458_v52 = vpop.f32.mrf.mxu0  ;;  %v2498_v53 = vpop.f32.mrf.mxu1  ;;  %v1636_v56 = vmax.f32 %v1600_v36, 0.0  ;;  %v3402_v5 = vmax.f32 %v3400_v31, %v3401_v32  ;;  %v3405_v7 = vmax.f32 %v3403_v10, %v3404_v6 }
 0x143   :  { %2258 = vst [vmem:[%s3318_s3 + $0x40] sm:$0xff] %v2204_v13   ;;  %v1601_v57 = vadd.f32 %v3121_v12, %v1558_v34  ;;  %v1167_v24 = vmax.f32 %v3390_v35, %v2458_v52  ;;  %v1556_v22 = vmax.f32 %v1162_v9, %v1475_v27  ;;  %v1634_v2 = vmax.f32 %v1598_v14, 0.0  ;;  %v3406_v9 = vld [vmem:[#allocation13_spill] sm:$0xff]  ;;  %v3407_v52 = vld [vmem:[#allocation14_spill] sm:$0xff]  ;;  %v3409_v14 = vld [vmem:[#allocation15_spill] sm:$0xff] }
 0x144   :  { %v1094_v23 = vpop.f32.mrf.mxu0  ;;  %v1488_v55 = vpop.f32.mrf.mxu1 }
 0x145   :  { %v1637_v51 = vmax.f32 %v1601_v57, 0.0  ;;  %v1561_v54 = vmax.f32 %v1167_v24, %v2498_v53  ;;  %v1165_v37 = vmax.f32 %v3393_v45, %v1094_v23  ;;  %v1599_v38 = vadd.f32 %v3121_v12, %v1556_v22  ;;  %v3410_v22 = vld [vmem:[#allocation16_spill] sm:$0xff] }
 0x146   :  { %v2459_v25 = vpop.f32.mrf.mxu0  ;;  %v2499_v26 = vpop.f32.mrf.mxu1  ;;  %v3408_v53 = vmax.f32 %v3406_v9, %v3407_v52  ;;  %v3411_v23 = vmax.f32 %v3409_v14, %v3410_v22 }
 0x147   :  { %v2219_v58 = vpack.c.bf16 %v1637_v51, %v1636_v56  ;;  %v1559_v59 = vmax.f32 %v1165_v37, %v1488_v55  ;;  %v1168_v42 = vmax.f32 %v3396_v41, %v2459_v25  ;;  %v1635_v15 = vmax.f32 %v1599_v38, 0.0  ;;  %v3412_v37 = vld [vmem:[#allocation17_spill] sm:$0xff]  ;;  %v3413_v38 = vld [vmem:[#allocation18_spill] sm:$0xff] }
 0x148   :  { %v1097_v16 = vpop.f32.mrf.mxu0  ;;  %v1491_v61 = vpop.f32.mrf.mxu1  ;;  %v1604_v62 = vadd.f32 %v3121_v12, %v1561_v54  ;;  %v3414_v25 = vmax.f32 %v3412_v37, %v3413_v38 }
 0x149   :  { %2261 = vst [vmem:[%s3318_s3 + $0x58] sm:$0xff] %v2219_v58   ;;  %v1562_v28 = vmax.f32 %v1168_v42, %v2499_v26  ;;  %v1166_v0 = vmax.f32 %v3399_v44, %v1097_v16  ;;  %v2214_v1 = vpack.c.bf16 %v1635_v15, %v1634_v2  ;;  %v1602_v33 = vadd.f32 %v3121_v12, %v1559_v59  ;;  %v3415_v42 = vld [vmem:[#allocation19_spill] sm:$0xff]  ;;  %v3416_v2 = vld [vmem:[#allocation20_spill] sm:$0xff]  ;;  %v3418_v44 = vld [vmem:[#allocation21_spill] sm:$0xff] }
 0x14a   :  { %v2462_v17 = vpop.f32.mrf.mxu0  ;;  %v2502_v30 = vpop.f32.mrf.mxu1  ;;  %v1640_v8 = vmax.f32 %v1604_v62, 0.0  ;;  %v3417_v15 = vmax.f32 %v3415_v42, %v3416_v2 }
 0x14b   :  { %v1605_v3 = vadd.f32 %v3121_v12, %v1562_v28  ;;  %v1560_v4 = vmax.f32 %v1166_v0, %v1491_v61  ;;  %v1171_v39 = vmax.f32 %v3402_v5, %v2462_v17  ;;  %2260 = vst [vmem:[%s3318_s3 + $0x50] sm:$0xff] %v2214_v1   ;;  %v1638_v13 = vmax.f32 %v1602_v33, 0.0  ;;  %v3419_v0 = vld [vmem:[#allocation22_spill] sm:$0xff] }
 0x14c   :  { %v1110_v46 = vpop.f32.mrf.mxu0  ;;  %v1504_v47 = vpop.f32.mrf.mxu1  ;;  %v3420_v1 = vmax.f32 %v3418_v44, %v3419_v0 }
 0x14d   :  { %v1641_v19 = vmax.f32 %v1605_v3, 0.0  ;;  %v1603_v20 = vadd.f32 %v3121_v12, %v1560_v4  ;;  %v1169_v49 = vmax.f32 %v3405_v7, %v1110_v46  ;;  %v1565_v50 = vmax.f32 %v1171_v39, %v2502_v30  ;;  %v3421_v39 = vld [vmem:[#allocation23_spill] sm:$0xff]  ;;  %v3422_v46 = vld [vmem:[#allocation24_spill] sm:$0xff] }
 0x14e   :  { %v2463_v11 = vpop.f32.mrf.mxu0  ;;  %v2503_v27 = vpop.f32.mrf.mxu1 }
 0x14f   :  { %v2229_v36 = vpack.c.bf16 %v1641_v19, %v1640_v8  ;;  %v1639_v34 = vmax.f32 %v1603_v20, 0.0  ;;  %v1563_v63 = vmax.f32 %v1169_v49, %v1504_v47  ;;  %v1172_v57 = vmax.f32 %v3408_v53, %v2463_v11 }
 0x150   :  { %v1113_v60 = vpop.f32.mrf.mxu0  ;;  %v1507_v35 = vpop.f32.mrf.mxu1  ;;  %v1608_v56 = vadd.f32 %v3121_v12, %v1565_v50  ;;  %v3423_v47 = vmax.f32 %v3421_v39, %v3422_v46 }
 0x151   :  { %2263 = vst [vmem:[%s3318_s3 + $0x68] sm:$0xff] %v2229_v36   ;;  %v2224_v24 = vpack.c.bf16 %v1639_v34, %v1638_v13  ;;  %v1170_v55 = vmax.f32 %v3411_v23, %v1113_v60  ;;  %v1566_v51 = vmax.f32 %v1172_v57, %v2503_v27  ;;  %v1606_v21 = vadd.f32 %v3121_v12, %v1563_v63 }
 0x152   :  { %v2466_v54 = vpop.f32.mrf.mxu0  ;;  %v2506_v18 = vpop.f32.mrf.mxu1  ;;  %v1644_v61 = vmax.f32 %v1608_v56, 0.0 }
 0x153   :  { %2262 = vst [vmem:[%s3318_s3 + $0x60] sm:$0xff] %v2224_v24   ;;  %v1564_v45 = vmax.f32 %v1170_v55, %v1507_v35  ;;  %v1175_v26 = vmax.f32 %v3414_v25, %v2466_v54  ;;  %v1609_v58 = vadd.f32 %v3121_v12, %v1566_v51  ;;  %v1642_v29 = vmax.f32 %v1606_v21, 0.0 }
 0x154   :  { %v1126_v59 = vpop.f32.mrf.mxu0  ;;  %v1520_v48 = vpop.f32.mrf.mxu1 }
 0x155   :  { %v1607_v40 = vadd.f32 %v3121_v12, %v1564_v45  ;;  %v1569_v41 = vmax.f32 %v1175_v26, %v2506_v18  ;;  %v1173_v16 = vmax.f32 %v3417_v15, %v1126_v59  ;;  %v1645_v62 = vmax.f32 %v1609_v58, 0.0 }
 0x156   :  { %v2467_v28 = vpop.f32.mrf.mxu0  ;;  %v2507_v30 = vpop.f32.mrf.mxu1 }
 0x157   :  { %v1643_v43 = vmax.f32 %v1607_v40, 0.0  ;;  %v1176_v17 = vmax.f32 %v3420_v1, %v2467_v28  ;;  %v2239_v33 = vpack.c.bf16 %v1645_v62, %v1644_v61  ;;  %v1567_v3 = vmax.f32 %v1173_v16, %v1520_v48 }
 0x158   :  { %v1129_v4 = vpop.f32.mrf.mxu0  ;;  %v1612_v32 = vadd.f32 %v3121_v12, %v1569_v41  ;;  %v1523_v20 = vpop.f32.mrf.mxu1 }
 0x159   :  { %v2234_v31 = vpack.c.bf16 %v1643_v43, %v1642_v29  ;;  %v1570_v5 = vmax.f32 %v1176_v17, %v2507_v30  ;;  %2265 = vst [vmem:[%s3318_s3 + $0x78] sm:$0xff] %v2239_v33   ;;  %v1174_v8 = vmax.f32 %v3423_v47, %v1129_v4  ;;  %v1610_v10 = vadd.f32 %v3121_v12, %v1567_v3 }
 0x15a   :  { %v1648_v7 = vmax.f32 %v1612_v32, 0.0 }
 0x15b   :  { %2264 = vst [vmem:[%s3318_s3 + $0x70] sm:$0xff] %v2234_v31   ;;  %v1613_v19 = vadd.f32 %v3121_v12, %v1570_v5  ;;  %v1568_v6 = vmax.f32 %v1174_v8, %v1523_v20  ;;  %v1646_v27 = vmax.f32 %v1610_v10, 0.0 }
 0x15d   :  { %v1649_v49 = vmax.f32 %v1613_v19, 0.0  ;;  %v1611_v50 = vadd.f32 %v3121_v12, %v1568_v6 }
 0x15f   :  { %v2249_v11 = vpack.c.bf16 %v1649_v49, %v1648_v7  ;;  %v1647_v13 = vmax.f32 %v1611_v50, 0.0 }
 0x161   :  { %2267 = vst [vmem:[%s3318_s3 + $0x88] sm:$0xff] %v2249_v11   ;;  %v2244_v36 = vpack.c.bf16 %v1647_v13, %v1646_v27 }
 0x163   :  { %2266 = vst [vmem:[%s3318_s3 + $0x80] sm:$0xff] %v2244_v36  }

// kernel: cnn_forward.4
= control target key start
LH: loop header
LB: loop body
LE: loop exit
PB: predicated region body
PF: predicated region fallthrough
CT: control target
= control target key end

     0   :  { %s854_s1 = inlined_call_operand.vmem [shape: bf16[256,128], index: 1, kind: input, shape index: {}]   ;;  %s855_s0 = inlined_call_operand.vmem [shape: bf16[4,32,256], index: 0, kind: input, shape index: {}]   ;;  %s856_s2 = inlined_call_operand.vmem [shape: f32[1,128], index: 2, kind: input, shape index: {}]   ;;  %s857_s3 = inlined_call_operand.vmem [shape: bf16[32,128], index: 3, kind: output, shape index: {}]  }
   0x1   :  { %v665_v0 = vld [vmem:[%s854_s1 + $0x78] sm:$0xff]   ;;  %v667_v2 = vld [vmem:[%s854_s1 + $0x70] sm:$0xff]   ;;  %v669_v4 = vld [vmem:[%s854_s1 + $0x68] sm:$0xff]  }
   0x2   :  { %v666_v1 = vld [vmem:[%s854_s1 + $0x38] sm:$0xff]   ;;  %553 = vmatprep.subr.bf16.mxu0 %v665_v0  ;;  %581 = vmatprep.subr.bf16.mxu1 %v665_v0  ;;  %v668_v3 = vld [vmem:[%s854_s1 + $0x30] sm:$0xff]   ;;  %v743_v5 = vld [vmem:[%s854_s1 + $0x28] sm:$0xff]  }
   0x3   :  { %554 = vmatpush3.bf16.msra.mxu0 %v666_v1  ;;  %582 = vmatpush3.bf16.msra.mxu1 %v666_v1  ;;  %v748_v6 = vld [vmem:[%s854_s1 + $0x60] sm:$0xff]   ;;  %v762_v8 = vld [vmem:[%s854_s1 + $0x58] sm:$0xff]   ;;  %v675_v10 = vld [vmem:[%s854_s1 + $0x50] sm:$0xff]  }
   0x4   :  { %555 = vmatprep.subr.bf16.mxu0 %v667_v2  ;;  %583 = vmatprep.subr.bf16.mxu1 %v667_v2  ;;  %v755_v7 = vld [vmem:[%s854_s1 + $0x20] sm:$0xff]   ;;  %v674_v9 = vld [vmem:[%s854_s1 + $0x18] sm:$0xff]   ;;  %v676_v13 = vld [vmem:[%s854_s1 + $0x10] sm:$0xff]  }
   0x5   :  { %v683_v11 = vld [vmem:[%s855_s0 + $0x4] ss:$8 sps:$4 sm:$0xff]   ;;  %v681_v18 = vld [vmem:[%s855_s0] ss:$8 sps:$4 sm:$0xff]   ;;  %v687_v20 = vld [vmem:[%s855_s0 + $0x14] ss:$8 sps:$4 sm:$0xff]  }
   0x6   :  { %v686_v12 = vld [vmem:[%s855_s0 + $0x24] ss:$8 sps:$4 sm:$0xff]   ;;  %199 = vmatprep.mubr.bf16.mxu0 %v683_v11  ;;  %v684_v19 = vld [vmem:[%s855_s0 + $0x20] ss:$8 sps:$4 sm:$0xff]   ;;  %v689_v21 = vld [vmem:[%s855_s0 + $0x34] ss:$8 sps:$4 sm:$0xff]  }
   0x7   :  { %556 = vmatpush3.bf16.msra.mxu0 %v668_v3  ;;  %584 = vmatpush3.bf16.msra.mxu1 %v668_v3  ;;  %v677_v14 = vld [vmem:[%s854_s1 + $0x48] sm:$0xff]   ;;  %v679_v16 = vld [vmem:[%s854_s1 + $0x40] sm:$0xff]   ;;  %v691_v22 = vld [vmem:[%s855_s0 + $0x10] ss:$8 sps:$4 sm:$0xff]  }
   0x8   :  { %557 = vmatprep.subr.bf16.mxu0 %v669_v4  ;;  %585 = vmatprep.subr.bf16.mxu1 %v669_v4  ;;  %v678_v15 = vld [vmem:[%s854_s1 + $0x8] sm:$0xff]   ;;  %v680_v17 = vld [vmem:[%s854_s1] sm:$0xff]   ;;  %v692_v23 = vld [vmem:[%s855_s0 + $0x30] ss:$8 sps:$4 sm:$0xff]  }
   0x9   :  { %273 = vmatprep.mubr.bf16.mxu1 %v686_v12  ;;  %v695_v24 = vld [vmem:[%s855_s0 + $0x44] ss:$8 sps:$4 sm:$0xff]   ;;  %v693_v26 = vld [vmem:[%s855_s0 + $0x40] ss:$8 sps:$4 sm:$0xff]   ;;  %v699_v28 = vld [vmem:[%s855_s0 + $0x54] ss:$8 sps:$4 sm:$0xff]  }
   0xa   :  { %v698_v25 = vld [vmem:[%s855_s0 + $0x64] ss:$8 sps:$4 sm:$0xff]   ;;  %v696_v27 = vld [vmem:[%s855_s0 + $0x60] ss:$8 sps:$4 sm:$0xff]   ;;  %v701_v29 = vld [vmem:[%s855_s0 + $0x74] ss:$8 sps:$4 sm:$0xff]  }
   0xb   :  { %558 = vmatpush3.bf16.msra.mxu0 %v743_v5  ;;  %586 = vmatpush3.bf16.msra.mxu1 %v743_v5  ;;  %v703_v30 = vld [vmem:[%s855_s0 + $0x50] ss:$8 sps:$4 sm:$0xff]  }
   0xc   :  { %559 = vmatprep.subr.bf16.mxu0 %v748_v6  ;;  %587 = vmatprep.subr.bf16.mxu1 %v748_v6  ;;  %v704_v31 = vld [vmem:[%s855_s0 + $0x70] ss:$8 sps:$4 sm:$0xff]  }
   0xf   :  { %560 = vmatpush3.bf16.msra.mxu0 %v755_v7  ;;  %588 = vmatpush3.bf16.msra.mxu1 %v755_v7 }
  0x10   :  { %561 = vmatprep.subr.bf16.mxu0 %v762_v8  ;;  %589 = vmatprep.subr.bf16.mxu1 %v762_v8 }
  0x13   :  { %562 = vmatpush3.bf16.msra.mxu0 %v674_v9  ;;  %590 = vmatpush3.bf16.msra.mxu1 %v674_v9 }
  0x14   :  { %563 = vmatprep.subr.bf16.mxu0 %v675_v10  ;;  %591 = vmatprep.subr.bf16.mxu1 %v675_v10 }
  0x17   :  { %564 = vmatpush3.bf16.msra.mxu0 %v676_v13  ;;  %592 = vmatpush3.bf16.msra.mxu1 %v676_v13 }
  0x18   :  { %565 = vmatprep.subr.bf16.mxu0 %v677_v14  ;;  %593 = vmatprep.subr.bf16.mxu1 %v677_v14 }
  0x1b   :  { %566 = vmatpush3.bf16.msra.mxu0 %v678_v15  ;;  %594 = vmatpush3.bf16.msra.mxu1 %v678_v15 }
  0x1c   :  { %567 = vmatprep.subr.bf16.mxu0 %v679_v16  ;;  %595 = vmatprep.subr.bf16.mxu1 %v679_v16 }
  0x1f   :  { %568 = vmatpush3.bf16.msra.mxu0 %v680_v17  ;;  %596 = vmatpush3.bf16.msra.mxu1 %v680_v17 }
  0x20   :  { %609 = vmatprep.subr.bf16.mxu0 %v665_v0  ;;  %637 = vmatprep.subr.bf16.mxu1 %v665_v0 }
  0x22   :  { %200 = vmatmul.mubr.bf16.vlgmr.msra.gmra.mxu0 %v681_v18  ;;  %274 = vmatmul.mubr.bf16.vlgmr.msra.gmra.mxu1 %v684_v19 }
  0x23   :  { %610 = vmatpush3.bf16.msra.mxu0 %v666_v1  ;;  %638 = vmatpush3.bf16.msra.mxu1 %v666_v1 }
  0x24   :  { %611 = vmatprep.subr.bf16.mxu0 %v667_v2  ;;  %639 = vmatprep.subr.bf16.mxu1 %v667_v2 }
  0x25   :  { %207 = vmatprep.mubr.bf16.mxu0 %v687_v20  ;;  %281 = vmatprep.mubr.bf16.mxu1 %v689_v21 }
  0x27   :  { %612 = vmatpush3.bf16.msra.mxu0 %v668_v3  ;;  %640 = vmatpush3.bf16.msra.mxu1 %v668_v3 }
  0x28   :  { %613 = vmatprep.subr.bf16.mxu0 %v669_v4  ;;  %641 = vmatprep.subr.bf16.mxu1 %v669_v4 }
  0x2a   :  { %208 = vmatmul.mubr.bf16.gmra.mxu0 %v691_v22  ;;  %282 = vmatmul.mubr.bf16.gmra.mxu1 %v692_v23 }
  0x2b   :  { %614 = vmatpush3.bf16.msra.mxu0 %v743_v5  ;;  %642 = vmatpush3.bf16.msra.mxu1 %v743_v5  ;;  %v533_v5 = vld [vmem:[%s856_s2] ss:$0 sm:$0xff] }
  0x2c   :  { %615 = vmatprep.subr.bf16.mxu0 %v748_v6  ;;  %643 = vmatprep.subr.bf16.mxu1 %v748_v6 }
  0x2d   :  { %351 = vmatprep.mubr.bf16.mxu0 %v695_v24  ;;  %429 = vmatprep.mubr.bf16.mxu1 %v698_v25 }
  0x2f   :  { %616 = vmatpush3.bf16.msra.mxu0 %v755_v7  ;;  %644 = vmatpush3.bf16.msra.mxu1 %v755_v7 }
  0x30   :  { %617 = vmatprep.subr.bf16.mxu0 %v762_v8  ;;  %645 = vmatprep.subr.bf16.mxu1 %v762_v8 }
  0x33   :  { %618 = vmatpush3.bf16.msra.mxu0 %v674_v9  ;;  %646 = vmatpush3.bf16.msra.mxu1 %v674_v9 }
  0x34   :  { %619 = vmatprep.subr.bf16.mxu0 %v675_v10  ;;  %647 = vmatprep.subr.bf16.mxu1 %v675_v10 }
  0x37   :  { %620 = vmatpush3.bf16.msra.mxu0 %v676_v13  ;;  %648 = vmatpush3.bf16.msra.mxu1 %v676_v13 }
  0x38   :  { %621 = vmatprep.subr.bf16.mxu0 %v677_v14  ;;  %649 = vmatprep.subr.bf16.mxu1 %v677_v14 }
  0x3b   :  { %622 = vmatpush3.bf16.msra.mxu0 %v678_v15  ;;  %650 = vmatpush3.bf16.msra.mxu1 %v678_v15 }
  0x3c   :  { %623 = vmatprep.subr.bf16.mxu0 %v679_v16  ;;  %651 = vmatprep.subr.bf16.mxu1 %v679_v16 }
  0x3f   :  { %624 = vmatpush3.bf16.msra.mxu0 %v680_v17  ;;  %652 = vmatpush3.bf16.msra.mxu1 %v680_v17 }
  0x42   :  { %352 = vmatmul.mubr.bf16.vlgmr.msra.gmra.mxu0 %v693_v26  ;;  %430 = vmatmul.mubr.bf16.vlgmr.msra.gmra.mxu1 %v696_v27 }
  0x43   :  { %359 = vmatprep.mubr.bf16.mxu0 %v699_v28  ;;  %437 = vmatprep.mubr.bf16.mxu1 %v701_v29 }
  0x4a   :  { %360 = vmatmul.mubr.bf16.gmra.mxu0 %v703_v30  ;;  %438 = vmatmul.mubr.bf16.gmra.mxu1 %v704_v31 }
  0xe2   :  { %v569_v32 = vpop.f32.mrf.mxu0  ;;  %v597_v33 = vpop.f32.mrf.mxu1 }
  0xe4   :  { %v570_v34 = vpop.f32.mrf.mxu0  ;;  %v598_v35 = vpop.f32.mrf.mxu1 }
  0xe5   :  { %v571_v48 = vadd.f32 %v570_v34, %v569_v32  ;;  %v599_v49 = vadd.f32 %v598_v35, %v597_v33 }
  0xe6   :  { %v572_v36 = vpop.f32.mrf.mxu0  ;;  %v600_v37 = vpop.f32.mrf.mxu1 }
  0xe7   :  { %v290_v56 = vmax.f32 %v571_v48, %v599_v49 }
  0xe8   :  { %v573_v38 = vpop.f32.mrf.mxu0  ;;  %v601_v39 = vpop.f32.mrf.mxu1 }
  0xe9   :  { %v574_v52 = vadd.f32 %v573_v38, %v572_v36  ;;  %v602_v53 = vadd.f32 %v601_v39, %v600_v37 }
  0xea   :  { %v575_v40 = vpop.f32.mrf.mxu0  ;;  %v603_v41 = vpop.f32.mrf.mxu1 }
  0xeb   :  { %v291_v62 = vmax.f32 %v574_v52, %v602_v53 }
  0xec   :  { %v576_v42 = vpop.f32.mrf.mxu0  ;;  %v604_v43 = vpop.f32.mrf.mxu1 }
  0xed   :  { %v577_v1 = vadd.f32 %v576_v42, %v575_v40  ;;  %v605_v2 = vadd.f32 %v604_v43, %v603_v41 }
  0xee   :  { %v578_v44 = vpop.f32.mrf.mxu0  ;;  %v606_v45 = vpop.f32.mrf.mxu1 }
  0xef   :  { %v292_v14 = vmax.f32 %v577_v1, %v605_v2 }
  0xf0   :  { %v579_v46 = vpop.f32.mrf.mxu0  ;;  %v607_v47 = vpop.f32.mrf.mxu1 }
  0xf1   :  { %v580_v10 = vadd.f32 %v579_v46, %v578_v44  ;;  %v608_v11 = vadd.f32 %v607_v47, %v606_v45 }
  0xf3   :  { %v293_v23 = vmax.f32 %v580_v10, %v608_v11 }
 0x102   :  { %v625_v50 = vpop.f32.mrf.mxu0  ;;  %v653_v51 = vpop.f32.mrf.mxu1 }
 0x104   :  { %v626_v54 = vpop.f32.mrf.mxu0  ;;  %v654_v55 = vpop.f32.mrf.mxu1 }
 0x105   :  { %v627_v57 = vadd.f32 %v626_v54, %v625_v50  ;;  %v655_v61 = vadd.f32 %v654_v55, %v653_v51 }
 0x106   :  { %v628_v58 = vpop.f32.mrf.mxu0  ;;  %v656_v59 = vpop.f32.mrf.mxu1 }
 0x107   :  { %v368_v60 = vmax.f32 %v290_v56, %v627_v57 }
 0x108   :  { %v629_v63 = vpop.f32.mrf.mxu0  ;;  %v657_v0 = vpop.f32.mrf.mxu1 }
 0x109   :  { %v446_v3 = vmax.f32 %v368_v60, %v655_v61  ;;  %v630_v4 = vadd.f32 %v629_v63, %v628_v58  ;;  %v658_v9 = vadd.f32 %v657_v0, %v656_v59 }
 0x10a   :  { %v631_v6 = vpop.f32.mrf.mxu0  ;;  %v659_v7 = vpop.f32.mrf.mxu1 }
 0x10b   :  { %v369_v8 = vmax.f32 %v291_v62, %v630_v4  ;;  %v457_v15 = vadd.f32 %v533_v5, %v446_v3 }
 0x10c   :  { %v632_v12 = vpop.f32.mrf.mxu0  ;;  %v660_v13 = vpop.f32.mrf.mxu1 }
 0x10d   :  { %v447_v16 = vmax.f32 %v369_v8, %v658_v9  ;;  %v633_v17 = vadd.f32 %v632_v12, %v631_v6  ;;  %v661_v22 = vadd.f32 %v660_v13, %v659_v7  ;;  %v461_v26 = vmax.f32 %v457_v15, 0.0 }
 0x10e   :  { %v634_v18 = vpop.f32.mrf.mxu0  ;;  %v662_v19 = vpop.f32.mrf.mxu1 }
 0x10f   :  { %v458_v20 = vadd.f32 %v533_v5, %v447_v16  ;;  %v370_v21 = vmax.f32 %v292_v14, %v633_v17 }
 0x110   :  { %v635_v24 = vpop.f32.mrf.mxu0  ;;  %v663_v25 = vpop.f32.mrf.mxu1 }
 0x111   :  { %v462_v27 = vmax.f32 %v458_v20, 0.0  ;;  %v448_v28 = vmax.f32 %v370_v21, %v661_v22  ;;  %v636_v29 = vadd.f32 %v635_v24, %v634_v18  ;;  %v664_v32 = vadd.f32 %v663_v25, %v662_v19 }
 0x113   :  { %v545_v30 = vpack.c.bf16 %v462_v27, %v461_v26  ;;  %v371_v31 = vmax.f32 %v293_v23, %v636_v29  ;;  %v459_v33 = vadd.f32 %v533_v5, %v448_v28 }
 0x115   :  { %546 = vst [vmem:[%s857_s3] sm:$0xff] %v545_v30   ;;  %v449_v34 = vmax.f32 %v371_v31, %v664_v32  ;;  %v463_v36 = vmax.f32 %v459_v33, 0.0 }
 0x117   :  { %v460_v35 = vadd.f32 %v533_v5, %v449_v34 }
 0x119   :  { %v464_v37 = vmax.f32 %v460_v35, 0.0 }
 0x11b   :  { %v550_v38 = vpack.c.bf16 %v464_v37, %v463_v36 }
 0x11d   :  { %552 = vst [vmem:[%s857_s3 + $0x8] sm:$0xff] %v550_v38  }

// kernel: cnn_forward.5
= control target key start
LH: loop header
LB: loop body
LE: loop exit
PB: predicated region body
PF: predicated region fallthrough
CT: control target
= control target key end

     0   :  { %v293_v28 = vlaneseq  ;;  %v2147_v36 = vmov 1966171168   ;;  %s2630_s0 = inlined_call_operand.vmem [shape: bf16[2,2048], index: 0, kind: input, shape index: {}]   ;;  %s2631_s1 = inlined_call_operand.vmem [shape: bf16[2048,128], index: 1, kind: input, shape index: {}]   ;;  %s2632_s2 = inlined_call_operand.vmem [shape: f32[1,128], index: 2, kind: input, shape index: {}]   ;;  %s2633_s3 = inlined_call_operand.vmem [shape: bf16[128,128], index: 3, kind: input, shape index: {}]   ;;  %s2634_s4 = inlined_call_operand.vmem [shape: f32[1,128], index: 4, kind: input, shape index: {}]   ;;  %s2635_s5 = inlined_call_operand.hbm [shape: f32[2,128], index: 5, kind: output, shape index: {}]  }
   0x1   :  { %v1983_v0 = vld [vmem:[%s2631_s1 + $0x78] sm:$0xff]   ;;  %v1987_v4 = vld [vmem:[%s2631_s1 + $0x70] sm:$0xff]   ;;  %v1991_v8 = vld [vmem:[%s2631_s1 + $0x68] sm:$0xff]   ;;  %v291_v37 = vunpack.c.l.s4 %v2147_v36 }
   0x2   :  { %v1984_v1 = vld [vmem:[%s2631_s1 + $0xf8] sm:$0xff]   ;;  %1774 = vmatprep.subr.bf16.mxu0 %v1983_v0  ;;  %v1988_v5 = vld [vmem:[%s2631_s1 + $0xf0] sm:$0xff]   ;;  %v1992_v9 = vld [vmem:[%s2631_s1 + $0xe8] sm:$0xff]   ;;  %v294_v33 = vshrl.u32 %v293_v28, 7 }
   0x3   :  { %v1985_v2 = vld [vmem:[%s2631_s1 + $0x38] sm:$0xff]   ;;  %1796 = vmatprep.subr.bf16.mxu1 %v1984_v1  ;;  %v1989_v6 = vld [vmem:[%s2631_s1 + $0x30] sm:$0xff]   ;;  %v1993_v10 = vld [vmem:[%s2631_s1 + $0x28] sm:$0xff]   ;;  %v292_v40 = vunpack.c.0.s8 %v291_v37 }
   0x4   :  { %v1986_v3 = vld [vmem:[%s2631_s1 + $0xb8] sm:$0xff]   ;;  %1775 = vmatpush3.bf16.msra.mxu0 %v1985_v2  ;;  %v1990_v7 = vld [vmem:[%s2631_s1 + $0xb0] sm:$0xff]   ;;  %v1994_v11 = vld [vmem:[%s2631_s1 + $0xa8] sm:$0xff]  }
   0x5   :  { %1797 = vmatpush3.bf16.msra.mxu1 %v1986_v3  ;;  %1776 = vmatprep.subr.bf16.mxu0 %v1987_v4  ;;  %v1995_v12 = vld [vmem:[%s2631_s1 + $0x60] sm:$0xff]   ;;  %v1999_v16 = vld [vmem:[%s2631_s1 + $0x58] sm:$0xff]   ;;  %v2003_v20 = vld [vmem:[%s2631_s1 + $0x50] sm:$0xff]   ;;  %v2287_v41 = vsub.s32 %v292_v40, %v294_v33 }
   0x6   :  { %1798 = vmatprep.subr.bf16.mxu1 %v1988_v5  ;;  %v1996_v13 = vld [vmem:[%s2631_s1 + $0xe0] sm:$0xff]   ;;  %v2000_v17 = vld [vmem:[%s2631_s1 + $0xd8] sm:$0xff]   ;;  %v2004_v21 = vld [vmem:[%s2631_s1 + $0xd0] sm:$0xff]  }
   0x7   :  { %v1997_v14 = vld [vmem:[%s2631_s1 + $0x20] sm:$0xff]   ;;  %v2001_v18 = vld [vmem:[%s2631_s1 + $0x18] sm:$0xff]   ;;  %v2005_v22 = vld [vmem:[%s2631_s1 + $0x10] sm:$0xff]  }
   0x8   :  { %1777 = vmatpush3.bf16.msra.mxu0 %v1989_v6  ;;  %v1998_v15 = vld [vmem:[%s2631_s1 + $0xa0] sm:$0xff]   ;;  %v2002_v19 = vld [vmem:[%s2631_s1 + $0x98] sm:$0xff]   ;;  %v2006_v23 = vld [vmem:[%s2631_s1 + $0x90] sm:$0xff]  }
   0x9   :  { %1799 = vmatpush3.bf16.msra.mxu1 %v1990_v7  ;;  %1778 = vmatprep.subr.bf16.mxu0 %v1991_v8  ;;  %v2007_v24 = vld [vmem:[%s2631_s1 + $0x48] sm:$0xff]   ;;  %v2011_v29 = vld [vmem:[%s2631_s1 + $0x40] sm:$0xff]   ;;  %v2016_v35 = vld [vmem:[%s2631_s1 + $0x178] sm:$0xff]  }
   0xa   :  { %1800 = vmatprep.subr.bf16.mxu1 %v1992_v9  ;;  %v2008_v25 = vld [vmem:[%s2631_s1 + $0xc8] sm:$0xff]   ;;  %v2012_v30 = vld [vmem:[%s2631_s1 + $0xc0] sm:$0xff]   ;;  %v2017_v38 = vld [vmem:[%s2631_s1 + $0x1f8] sm:$0xff]  }
   0xb   :  { %v2009_v26 = vld [vmem:[%s2631_s1 + $0x8] sm:$0xff]   ;;  %v2013_v31 = vld [vmem:[%s2631_s1] sm:$0xff]   ;;  %v2018_v47 = vld [vmem:[%s2631_s1 + $0x138] sm:$0xff]  }
   0xc   :  { %1779 = vmatpush3.bf16.msra.mxu0 %v1993_v10  ;;  %v2010_v27 = vld [vmem:[%s2631_s1 + $0x88] sm:$0xff]   ;;  %v2014_v32 = vld [vmem:[%s2631_s1 + $0x80] sm:$0xff]   ;;  %v2019_v49 = vld [vmem:[%s2631_s1 + $0x1b8] sm:$0xff]  }
   0xd   :  { %1801 = vmatpush3.bf16.msra.mxu1 %v1994_v11  ;;  %1780 = vmatprep.subr.bf16.mxu0 %v1995_v12  ;;  %v22_v34 = vld [vmem:[%s2630_s0] sm:$0xff]  ;;  %v2020_v52 = vld [vmem:[%s2631_s1 + $0x170] sm:$0xff]   ;;  %v2024_v58 = vld [vmem:[%s2631_s1 + $0x168] sm:$0xff]  }
   0xe   :  { %1802 = vmatprep.subr.bf16.mxu1 %v1996_v13  ;;  %v289_v39 = vcombine.high %v22_v34, %v22_v34  ;;  %v296_v42 = vrot.slane %v22_v34, %v2287_v41  ;;  %v2021_v54 = vld [vmem:[%s2631_s1 + $0x1f0] sm:$0xff]   ;;  %v2025_v59 = vld [vmem:[%s2631_s1 + $0x1e8] sm:$0xff]   ;;  %v2028_v62 = vld [vmem:[%s2631_s1 + $0x160] sm:$0xff]  }
   0xf   :  { %v2022_v55 = vld [vmem:[%s2631_s1 + $0x130] sm:$0xff]   ;;  %v2026_v60 = vld [vmem:[%s2631_s1 + $0x128] sm:$0xff]   ;;  %v2029_v63 = vld [vmem:[%s2631_s1 + $0x1e0] sm:$0xff]  }
  0x10   :  { %1781 = vmatpush3.bf16.msra.mxu0 %v1997_v14  ;;  %v2291_v43 = vrot.slane %v289_v39, %v2287_v41  ;;  %v304_v44 = vcombine.high %v296_v42, %v296_v42  ;;  %v312_v45 = vrot.slane %v296_v42, %v2287_v41  ;;  %v2023_v57 = vld [vmem:[%s2631_s1 + $0x1b0] sm:$0xff]   ;;  %v2027_v61 = vld [vmem:[%s2631_s1 + $0x1a8] sm:$0xff]   ;;  %v2030_v0 = vld [vmem:[%s2631_s1 + $0x120] sm:$0xff]  }
  0x11   :  { %1803 = vmatpush3.bf16.msra.mxu1 %v1998_v15  ;;  %1782 = vmatprep.subr.bf16.mxu0 %v1999_v16  ;;  %v2031_v1 = vld [vmem:[%s2631_s1 + $0x1a0] sm:$0xff]   ;;  %v2032_v2 = vld [vmem:[%s2631_s1 + $0x158] sm:$0xff]   ;;  %v2036_v6 = vld [vmem:[%s2631_s1 + $0x150] sm:$0xff]  }
  0x12   :  { %1804 = vmatprep.subr.bf16.mxu1 %v2000_v17  ;;  %v305_v46 = vcombine.high %v2291_v43, %v2291_v43  ;;  %v326_v48 = vrot.slane %v304_v44, %v2287_v41  ;;  %v334_v51 = vcombine.high %v312_v45, %v312_v45  ;;  %v2033_v3 = vld [vmem:[%s2631_s1 + $0x1d8] sm:$0xff]   ;;  %v2037_v7 = vld [vmem:[%s2631_s1 + $0x1d0] sm:$0xff]   ;;  %v2040_v10 = vld [vmem:[%s2631_s1 + $0x148] sm:$0xff]  }
  0x13   :  { %v2034_v4 = vld [vmem:[%s2631_s1 + $0x118] sm:$0xff]   ;;  %v2038_v8 = vld [vmem:[%s2631_s1 + $0x110] sm:$0xff]   ;;  %v2041_v11 = vld [vmem:[%s2631_s1 + $0x1c8] sm:$0xff]  }
  0x14   :  { %1783 = vmatpush3.bf16.msra.mxu0 %v2001_v18  ;;  %v333_v50 = vrot.slane %v305_v46, %v2287_v41  ;;  %1203 = vmatprep.mubr.bf16.mxu0 %v326_v48  ;;  %v336_v53 = vcombine.high %v326_v48, %v326_v48  ;;  %v2035_v5 = vld [vmem:[%s2631_s1 + $0x198] sm:$0xff]   ;;  %v2039_v9 = vld [vmem:[%s2631_s1 + $0x190] sm:$0xff]   ;;  %v2042_v12 = vld [vmem:[%s2631_s1 + $0x108] sm:$0xff]   ;;  %v319_v18 = vrot.slane %v2291_v43, %v2287_v41 }
  0x15   :  { %1805 = vmatpush3.bf16.msra.mxu1 %v2002_v19  ;;  %1784 = vmatprep.subr.bf16.mxu0 %v2003_v20  ;;  %v2043_v13 = vld [vmem:[%s2631_s1 + $0x188] sm:$0xff]   ;;  %v2044_v14 = vld [vmem:[%s2631_s1 + $0x140] sm:$0xff]   ;;  %v2048_v19 = vld [vmem:[%s2631_s1 + $0x278] sm:$0xff]  }
  0x16   :  { %1806 = vmatprep.subr.bf16.mxu1 %v2004_v21  ;;  %v337_v56 = vcombine.high %v333_v50, %v333_v50  ;;  %1243 = vmatprep.mubr.bf16.mxu1 %v336_v53  ;;  %v2045_v15 = vld [vmem:[%s2631_s1 + $0x1c0] sm:$0xff]   ;;  %v2049_v20 = vld [vmem:[%s2631_s1 + $0x2f8] sm:$0xff]   ;;  %v2068_v42 = vld [vmem:[%s2631_s1 + $0x250] sm:$0xff]  }
  0x17   :  { %v2046_v16 = vld [vmem:[%s2631_s1 + $0x100] sm:$0xff]   ;;  %v2050_v21 = vld [vmem:[%s2631_s1 + $0x238] sm:$0xff]   ;;  %v2069_v43 = vld [vmem:[%s2631_s1 + $0x2d0] sm:$0xff]  }
  0x18   :  { %1785 = vmatpush3.bf16.msra.mxu0 %v2005_v22  ;;  %v2047_v17 = vld [vmem:[%s2631_s1 + $0x180] sm:$0xff]   ;;  %v2051_v22 = vld [vmem:[%s2631_s1 + $0x2b8] sm:$0xff]   ;;  %v2070_v44 = vld [vmem:[%s2631_s1 + $0x210] sm:$0xff]  }
  0x19   :  { %1807 = vmatpush3.bf16.msra.mxu1 %v2006_v23  ;;  %1786 = vmatprep.subr.bf16.mxu0 %v2007_v24  ;;  %v335_v23 = vcombine.high %v319_v18, %v319_v18  ;;  %v2052_v24 = vld [vmem:[%s2631_s1 + $0x270] sm:$0xff]   ;;  %v2060_v33 = vld [vmem:[%s2631_s1 + $0x260] sm:$0xff]   ;;  %v2064_v37 = vld [vmem:[%s2631_s1 + $0x258] sm:$0xff]  }
  0x1a   :  { %1808 = vmatprep.subr.bf16.mxu1 %v2008_v25  ;;  %v2053_v25 = vld [vmem:[%s2631_s1 + $0x2f0] sm:$0xff]   ;;  %v2061_v34 = vld [vmem:[%s2631_s1 + $0x2e0] sm:$0xff]   ;;  %v2066_v39 = vld [vmem:[%s2631_s1 + $0x218] sm:$0xff]  }
  0x1b   :  { %v2063_v36 = vld [vmem:[%s2631_s1 + $0x2a0] sm:$0xff]   ;;  %v2067_v40 = vld [vmem:[%s2631_s1 + $0x298] sm:$0xff]   ;;  %v2072_v46 = vld [vmem:[%s2631_s1 + $0x248] sm:$0xff]  }
  0x1c   :  { %1787 = vmatpush3.bf16.msra.mxu0 %v2009_v26  ;;  %v2054_v26 = vld [vmem:[%s2631_s1 + $0x230] sm:$0xff]   ;;  %v2073_v48 = vld [vmem:[%s2631_s1 + $0x2c8] sm:$0xff]  }
  0x1d   :  { %1809 = vmatpush3.bf16.msra.mxu1 %v2010_v27  ;;  %1788 = vmatprep.subr.bf16.mxu0 %v2011_v29  ;;  %v2055_v27 = vld [vmem:[%s2631_s1 + $0x2b0] sm:$0xff]   ;;  %v2056_v29 = vld [vmem:[%s2631_s1 + $0x268] sm:$0xff]  }
  0x1e   :  { %1810 = vmatprep.subr.bf16.mxu1 %v2012_v30  ;;  %v2057_v30 = vld [vmem:[%s2631_s1 + $0x2e8] sm:$0xff]  }
  0x20   :  { %1789 = vmatpush3.bf16.msra.mxu0 %v2013_v31  ;;  %v2058_v31 = vld [vmem:[%s2631_s1 + $0x228] sm:$0xff]  }
  0x21   :  { %1811 = vmatpush3.bf16.msra.mxu1 %v2014_v32  ;;  %1818 = vmatprep.subr.bf16.mxu0 %v2016_v35  ;;  %v2059_v32 = vld [vmem:[%s2631_s1 + $0x2a8] sm:$0xff]   ;;  %v2062_v35 = vld [vmem:[%s2631_s1 + $0x220] sm:$0xff]  }
  0x22   :  { %1840 = vmatprep.subr.bf16.mxu1 %v2017_v38  ;;  %v2065_v38 = vld [vmem:[%s2631_s1 + $0x2d8] sm:$0xff]  }
  0x23   :  { %1204 = vmatmul.mubr.bf16.vlgmr.msra.gmra.mxu0 %v312_v45  ;;  %v2071_v45 = vld [vmem:[%s2631_s1 + $0x290] sm:$0xff]  }
  0x24   :  { %1819 = vmatpush3.bf16.msra.mxu0 %v2018_v47  ;;  %1244 = vmatmul.mubr.bf16.vlgmr.msra.gmra.mxu1 %v334_v51  ;;  %v23_v47 = vld [vmem:[%s2630_s0 + $0x8] sm:$0xff] }
  0x25   :  { %1820 = vmatprep.subr.bf16.mxu0 %v2020_v52  ;;  %1841 = vmatpush3.bf16.msra.mxu1 %v2019_v49  ;;  %v345_v49 = vrot.slane %v23_v47, %v2287_v41  ;;  %v2074_v51 = vld [vmem:[%s2631_s1 + $0x208] sm:$0xff]  }
  0x26   :  { %1283 = vmatprep.mubr.bf16.mxu0 %v333_v50  ;;  %1842 = vmatprep.subr.bf16.mxu1 %v2021_v54  ;;  %v338_v50 = vcombine.high %v23_v47, %v23_v47  ;;  %v2075_v52 = vld [vmem:[%s2631_s1 + $0x288] sm:$0xff]  }
  0x27   :  { %1323 = vmatprep.mubr.bf16.mxu1 %v337_v56  ;;  %v353_v53 = vcombine.high %v345_v49, %v345_v49  ;;  %v2077_v56 = vld [vmem:[%s2631_s1 + $0x2c0] sm:$0xff]  }
  0x28   :  { %1821 = vmatpush3.bf16.msra.mxu0 %v2022_v55  ;;  %v2479_v54 = vrot.slane %v338_v50, %v2287_v41  ;;  %v2076_v55 = vld [vmem:[%s2631_s1 + $0x240] sm:$0xff]  }
  0x29   :  { %1822 = vmatprep.subr.bf16.mxu0 %v2024_v58  ;;  %1843 = vmatpush3.bf16.msra.mxu1 %v2023_v57  ;;  %v375_v57 = vrot.slane %v353_v53, %v2287_v41 }
  0x2a   :  { %1844 = vmatprep.subr.bf16.mxu1 %v2025_v59  ;;  %v354_v58 = vcombine.high %v2479_v54, %v2479_v54  ;;  %v2078_v59 = vld [vmem:[%s2631_s1 + $0x200] sm:$0xff]  }
  0x2c   :  { %1823 = vmatpush3.bf16.msra.mxu0 %v2026_v60  ;;  %v2079_v60 = vld [vmem:[%s2631_s1 + $0x280] sm:$0xff]  }
  0x2d   :  { %1824 = vmatprep.subr.bf16.mxu0 %v2028_v62  ;;  %1845 = vmatpush3.bf16.msra.mxu1 %v2027_v61  ;;  %v385_v61 = vcombine.high %v375_v57, %v375_v57  ;;  %v361_v62 = vrot.slane %v345_v49, %v2287_v41 }
  0x2e   :  { %1846 = vmatprep.subr.bf16.mxu1 %v2029_v63  ;;  %v2080_v63 = vld [vmem:[%s2631_s1 + $0x378] sm:$0xff]  }
  0x30   :  { %1825 = vmatpush3.bf16.msra.mxu0 %v2030_v0  ;;  %v2081_v0 = vld [vmem:[%s2631_s1 + $0x3f8] sm:$0xff]  }
  0x31   :  { %1826 = vmatprep.subr.bf16.mxu0 %v2032_v2  ;;  %1847 = vmatpush3.bf16.msra.mxu1 %v2031_v1  ;;  %v382_v1 = vrot.slane %v354_v58, %v2287_v41  ;;  %v2082_v2 = vld [vmem:[%s2631_s1 + $0x338] sm:$0xff]  }
  0x32   :  { %1848 = vmatprep.subr.bf16.mxu1 %v2033_v3  ;;  %v2083_v3 = vld [vmem:[%s2631_s1 + $0x3b8] sm:$0xff]  }
  0x34   :  { %1827 = vmatpush3.bf16.msra.mxu0 %v2034_v4  ;;  %v383_v4 = vcombine.high %v361_v62, %v361_v62 }
  0x35   :  { %1828 = vmatprep.subr.bf16.mxu0 %v2036_v6  ;;  %1849 = vmatpush3.bf16.msra.mxu1 %v2035_v5  ;;  %v2084_v5 = vld [vmem:[%s2631_s1 + $0x370] sm:$0xff]  }
  0x36   :  { %1850 = vmatprep.subr.bf16.mxu1 %v2037_v7  ;;  %v2085_v6 = vld [vmem:[%s2631_s1 + $0x3f0] sm:$0xff]   ;;  %v386_v7 = vcombine.high %v382_v1, %v382_v1 }
  0x38   :  { %1829 = vmatpush3.bf16.msra.mxu0 %v2038_v8  ;;  %v2086_v8 = vld [vmem:[%s2631_s1 + $0x330] sm:$0xff]  }
  0x39   :  { %1830 = vmatprep.subr.bf16.mxu0 %v2040_v10  ;;  %1851 = vmatpush3.bf16.msra.mxu1 %v2039_v9  ;;  %v2087_v9 = vld [vmem:[%s2631_s1 + $0x3b0] sm:$0xff]   ;;  %v2088_v10 = vld [vmem:[%s2631_s1 + $0x368] sm:$0xff]  }
  0x3a   :  { %1852 = vmatprep.subr.bf16.mxu1 %v2041_v11  ;;  %v2089_v11 = vld [vmem:[%s2631_s1 + $0x3e8] sm:$0xff]  }
  0x3c   :  { %1831 = vmatpush3.bf16.msra.mxu0 %v2042_v12  ;;  %v2090_v12 = vld [vmem:[%s2631_s1 + $0x328] sm:$0xff]  }
  0x3d   :  { %1832 = vmatprep.subr.bf16.mxu0 %v2044_v14  ;;  %1853 = vmatpush3.bf16.msra.mxu1 %v2043_v13  ;;  %v2091_v13 = vld [vmem:[%s2631_s1 + $0x3a8] sm:$0xff]   ;;  %v2092_v14 = vld [vmem:[%s2631_s1 + $0x360] sm:$0xff]  }
  0x3e   :  { %1854 = vmatprep.subr.bf16.mxu1 %v2045_v15  ;;  %v2093_v15 = vld [vmem:[%s2631_s1 + $0x3e0] sm:$0xff]  }
  0x40   :  { %1833 = vmatpush3.bf16.msra.mxu0 %v2046_v16  ;;  %v2094_v16 = vld [vmem:[%s2631_s1 + $0x320] sm:$0xff]  }
  0x41   :  { %1862 = vmatprep.subr.bf16.mxu0 %v2048_v19  ;;  %1855 = vmatpush3.bf16.msra.mxu1 %v2047_v17  ;;  %v2095_v17 = vld [vmem:[%s2631_s1 + $0x3a0] sm:$0xff]   ;;  %v2097_v19 = vld [vmem:[%s2631_s1 + $0x3d8] sm:$0xff]  }
  0x42   :  { %1884 = vmatprep.subr.bf16.mxu1 %v2049_v20  ;;  %v2098_v20 = vld [vmem:[%s2631_s1 + $0x318] sm:$0xff]  }
  0x43   :  { %1284 = vmatmul.mubr.bf16.vlgmr.msra.gmra.mxu0 %v319_v18  ;;  %v2096_v18 = vld [vmem:[%s2631_s1 + $0x358] sm:$0xff]  }
  0x44   :  { %1863 = vmatpush3.bf16.msra.mxu0 %v2050_v21  ;;  %1324 = vmatmul.mubr.bf16.vlgmr.msra.gmra.mxu1 %v335_v23  ;;  %v2099_v21 = vld [vmem:[%s2631_s1 + $0x398] sm:$0xff]   ;;  %v2101_v23 = vld [vmem:[%s2631_s1 + $0x3d0] sm:$0xff]  }
  0x45   :  { %1864 = vmatprep.subr.bf16.mxu0 %v2052_v24  ;;  %1885 = vmatpush3.bf16.msra.mxu1 %v2051_v22  ;;  %v2100_v22 = vld [vmem:[%s2631_s1 + $0x350] sm:$0xff]  }
  0x46   :  { %1886 = vmatprep.subr.bf16.mxu1 %v2053_v25  ;;  %1363 = vmatprep.mubr.bf16.mxu0 %v375_v57  ;;  %v2102_v24 = vld [vmem:[%s2631_s1 + $0x310] sm:$0xff]  }
  0x47   :  { %1403 = vmatprep.mubr.bf16.mxu1 %v385_v61  ;;  %v2103_v25 = vld [vmem:[%s2631_s1 + $0x390] sm:$0xff]  }
  0x48   :  { %1865 = vmatpush3.bf16.msra.mxu0 %v2054_v26  ;;  %v2104_v26 = vld [vmem:[%s2631_s1 + $0x348] sm:$0xff]  }
  0x49   :  { %1866 = vmatprep.subr.bf16.mxu0 %v2056_v29  ;;  %1887 = vmatpush3.bf16.msra.mxu1 %v2055_v27  ;;  %v2105_v27 = vld [vmem:[%s2631_s1 + $0x3c8] sm:$0xff]  }
  0x4a   :  { %1888 = vmatprep.subr.bf16.mxu1 %v2057_v30  ;;  %v2106_v29 = vld [vmem:[%s2631_s1 + $0x308] sm:$0xff]   ;;  %v2108_v30 = vld [vmem:[%s2631_s1 + $0x340] sm:$0xff]  }
  0x4c   :  { %1867 = vmatpush3.bf16.msra.mxu0 %v2058_v31  ;;  %v2107_v31 = vld [vmem:[%s2631_s1 + $0x388] sm:$0xff]  }
  0x4d   :  { %1868 = vmatprep.subr.bf16.mxu0 %v2060_v33  ;;  %1889 = vmatpush3.bf16.msra.mxu1 %v2059_v32  ;;  %v2109_v32 = vld [vmem:[%s2631_s1 + $0x3c0] sm:$0xff]  }
  0x4e   :  { %1890 = vmatprep.subr.bf16.mxu1 %v2061_v34 }
  0x50   :  { %1869 = vmatpush3.bf16.msra.mxu0 %v2062_v35 }
  0x51   :  { %1870 = vmatprep.subr.bf16.mxu0 %v2064_v37  ;;  %1891 = vmatpush3.bf16.msra.mxu1 %v2063_v36 }
  0x52   :  { %1892 = vmatprep.subr.bf16.mxu1 %v2065_v38 }
  0x54   :  { %1871 = vmatpush3.bf16.msra.mxu0 %v2066_v39 }
  0x55   :  { %1872 = vmatprep.subr.bf16.mxu0 %v2068_v42  ;;  %1893 = vmatpush3.bf16.msra.mxu1 %v2067_v40 }
  0x56   :  { %1894 = vmatprep.subr.bf16.mxu1 %v2069_v43 }
  0x58   :  { %1873 = vmatpush3.bf16.msra.mxu0 %v2070_v44 }
  0x59   :  { %1874 = vmatprep.subr.bf16.mxu0 %v2072_v46  ;;  %1895 = vmatpush3.bf16.msra.mxu1 %v2071_v45 }
  0x5a   :  { %1896 = vmatprep.subr.bf16.mxu1 %v2073_v48 }
  0x5c   :  { %1875 = vmatpush3.bf16.msra.mxu0 %v2074_v51 }
  0x5d   :  { %1876 = vmatprep.subr.bf16.mxu0 %v2076_v55  ;;  %1897 = vmatpush3.bf16.msra.mxu1 %v2075_v52 }
  0x5e   :  { %1898 = vmatprep.subr.bf16.mxu1 %v2077_v56 }
  0x60   :  { %1877 = vmatpush3.bf16.msra.mxu0 %v2078_v59 }
  0x61   :  { %1906 = vmatprep.subr.bf16.mxu0 %v2080_v63  ;;  %1899 = vmatpush3.bf16.msra.mxu1 %v2079_v60 }
  0x62   :  { %1928 = vmatprep.subr.bf16.mxu1 %v2081_v0 }
  0x63   :  { %1364 = vmatmul.mubr.bf16.vlgmr.msra.gmra.mxu0 %v361_v62 }
  0x64   :  { %1907 = vmatpush3.bf16.msra.mxu0 %v2082_v2  ;;  %1443 = vmatprep.mubr.bf16.mxu0 %v382_v1 }
  0x65   :  { %1404 = vmatmul.mubr.bf16.vlgmr.msra.gmra.mxu1 %v383_v4  ;;  %1908 = vmatprep.subr.bf16.mxu0 %v2084_v5 }
  0x66   :  { %1929 = vmatpush3.bf16.msra.mxu1 %v2083_v3  ;;  %1483 = vmatprep.mubr.bf16.mxu1 %v386_v7 }
  0x67   :  { %1930 = vmatprep.subr.bf16.mxu1 %v2085_v6 }
  0x68   :  { %1909 = vmatpush3.bf16.msra.mxu0 %v2086_v8 }
  0x69   :  { %1910 = vmatprep.subr.bf16.mxu0 %v2088_v10 }
  0x6a   :  { %1931 = vmatpush3.bf16.msra.mxu1 %v2087_v9 }
  0x6b   :  { %1932 = vmatprep.subr.bf16.mxu1 %v2089_v11 }
  0x6c   :  { %1911 = vmatpush3.bf16.msra.mxu0 %v2090_v12 }
  0x6d   :  { %1912 = vmatprep.subr.bf16.mxu0 %v2092_v14 }
  0x6e   :  { %1933 = vmatpush3.bf16.msra.mxu1 %v2091_v13 }
  0x6f   :  { %1934 = vmatprep.subr.bf16.mxu1 %v2093_v15 }
  0x70   :  { %1913 = vmatpush3.bf16.msra.mxu0 %v2094_v16 }
  0x71   :  { %1914 = vmatprep.subr.bf16.mxu0 %v2096_v18 }
  0x72   :  { %1935 = vmatpush3.bf16.msra.mxu1 %v2095_v17 }
  0x73   :  { %1936 = vmatprep.subr.bf16.mxu1 %v2097_v19 }
  0x74   :  { %1915 = vmatpush3.bf16.msra.mxu0 %v2098_v20 }
  0x75   :  { %1916 = vmatprep.subr.bf16.mxu0 %v2100_v22 }
  0x76   :  { %1937 = vmatpush3.bf16.msra.mxu1 %v2099_v21 }
  0x77   :  { %1938 = vmatprep.subr.bf16.mxu1 %v2101_v23 }
  0x78   :  { %1917 = vmatpush3.bf16.msra.mxu0 %v2102_v24 }
  0x79   :  { %1918 = vmatprep.subr.bf16.mxu0 %v2104_v26 }
  0x7a   :  { %1939 = vmatpush3.bf16.msra.mxu1 %v2103_v25 }
  0x7b   :  { %1940 = vmatprep.subr.bf16.mxu1 %v2105_v27 }
  0x7c   :  { %10 = vsyncpa [#allocation3], 0  ;;  %1919 = vmatpush3.bf16.msra.mxu0 %v2106_v29  ;;  %v2110_v33 = vld [vmem:[%s2631_s1 + $0x300] sm:$0xff]   ;;  %v368_v34 = vrot.slane %v2479_v54, %v2287_v41  ;;  %v2113_v37 = vld [vmem:[%s2633_s3 + $0x38] sm:$0xff]   ;;  %v2148_v38 = vmov 0.0   ;;  %vm2149_vm0 = vmmov 0  }
  0x7d   :  { %1920 = vmatprep.subr.bf16.mxu0 %v2108_v30  ;;  %v2111_v35 = vld [vmem:[%s2631_s1 + $0x380] sm:$0xff]   ;;  %v2114_v41 = vld [vmem:[%s2633_s3 + $0x30] sm:$0xff]   ;;  %v2115_v39 = vld [vmem:[%s2633_s3 + $0x28] sm:$0xff]   ;;  %vm1608_vm2 = vcmask 1041408  }
  0x7e   :  { %1941 = vmatpush3.bf16.msra.mxu1 %v2107_v31  ;;  %v384_v36 = vcombine.high %v368_v34, %v368_v34  ;;  %v2116_v40 = vld [vmem:[%s2633_s3 + $0x20] sm:$0xff]   ;;  %v2117_v42 = vld [vmem:[%s2633_s3 + $0x18] sm:$0xff]   ;;  %v2118_v43 = vld [vmem:[%s2633_s3 + $0x10] sm:$0xff]  }
  0x7f   :  { %1942 = vmatprep.subr.bf16.mxu1 %v2109_v32  ;;  %v2119_v44 = vld [vmem:[%s2633_s3 + $0x8] sm:$0xff]   ;;  %v2120_v45 = vld [vmem:[%s2633_s3] sm:$0xff]  }
  0x80   :  { %1921 = vmatpush3.bf16.msra.mxu0 %v2110_v33  ;;  %v1636_v48 = vld [vmem:[%s2632_s2] ss:$0 sm:$0xff] }
  0x81   :  { %1959 = vmatprep.subr.bf16.mxu0 %v2148_v38 }
  0x82   :  { %1943 = vmatpush3.bf16.msra.mxu1 %v2111_v35  ;;  %v1765_v35 = vld [vmem:[%s2634_s4] ss:$0 sm:$0xff]  ;;  %s2150_s4 = smov [#allocation2]  }
  0x83   :  { %1444 = vmatmul.mubr.bf16.vlgmr.msra.gmra.mxu0 %v368_v34  ;;  %v1605_v34 = vand.u32 127, %v293_v28  ;;  %s1628_s16 = sshll.u32 %s2150_s4, 4  ;;  %s1629_s16 = int_to_ptr.vmem [resolvable:$true] %s1628_s16 }
  0x84   :  { %1960 = vmatpush3.bf16.msra.mxu0 %v2113_v37  ;;  %1975 = vmatprep.mubr.msk.bf16.mxu0 %vm2149_vm0, %v2148_v38  ;;  %s2125_s17 = scalar_lea.vmem %s1629_s16, 32  ;;  %p2130_p1 = scmp.lt.s32.totalorder %s1629_s16, %s1629_s16 }
  0x85   :  { %1484 = vmatmul.mubr.bf16.vlgmr.msra.gmra.mxu1 %v384_v36  ;;  %1961 = vmatprep.subr.bf16.mxu0 %v2148_v38  ;;  %vm1606_vm1 = vcmp.lt.s32.totalorder %v1605_v34, 10  ;;  %p2126_p0 = scmp.ne.s32.totalorder %s1629_s16, %s2125_s17  ;;  %p2131_p2 = scmp.lt.s32.totalorder %s2125_s17, %s2125_s17 }
  0x87   :  { %p2132_p3 = por %p2131_p2, %p2130_p1 }
  0x88   :  { %1962 = vmatpush3.bf16.msra.mxu0 %v2114_v41 }
  0x89   :  { %1963 = vmatprep.subr.bf16.mxu0 %v2148_v38  ;;  %p2133_p4 = pnand %p2132_p3, %p2126_p0 }
  0x8c   :  { %1964 = vmatpush3.bf16.msra.mxu0 %v2115_v39 }
  0x8d   :  { %1965 = vmatprep.subr.bf16.mxu0 %v2148_v38 }
  0x90   :  { %1966 = vmatpush3.bf16.msra.mxu0 %v2116_v40 }
  0x91   :  { %1967 = vmatprep.subr.bf16.mxu0 %v2148_v38 }
  0x94   :  { %1968 = vmatpush3.bf16.msra.mxu0 %v2117_v42 }
  0x95   :  { %1969 = vmatprep.subr.bf16.mxu0 %v2148_v38 }
  0x98   :  { %1970 = vmatpush3.bf16.msra.mxu0 %v2118_v43 }
  0x99   :  { %1971 = vmatprep.subr.bf16.mxu0 %v2148_v38 }
  0x9c   :  { %1972 = vmatpush3.bf16.msra.mxu0 %v2119_v44 }
  0x9d   :  { %1973 = vmatprep.subr.bf16.mxu0 %v2148_v38 }
  0xa0   :  { %1974 = vmatpush3.bf16.msra.mxu0 %v2120_v45 }
  0xe3   :  { %v1790_v46 = vpop.f32.mrf.mxu0 }
  0xe4   :  { %v1812_v47 = vpop.f32.mrf.mxu1 }
  0xe5   :  { %v1791_v49 = vpop.f32.mrf.mxu0 }
  0xe6   :  { %v1792_v50 = vadd.f32 %v1791_v49, %v1790_v46  ;;  %v1813_v51 = vpop.f32.mrf.mxu1 }
  0xe7   :  { %v1793_v52 = vpop.f32.mrf.mxu0  ;;  %v1814_v54 = vadd.f32 %v1813_v51, %v1812_v47 }
  0xe8   :  { %v1206_v53 = vadd.f32 %v1792_v50, %v1636_v48  ;;  %v1815_v55 = vpop.f32.mrf.mxu1 }
  0xe9   :  { %v1794_v56 = vpop.f32.mrf.mxu0 }
  0xea   :  { %v1246_v57 = vadd.f32 %v1814_v54, %v1206_v53  ;;  %v1816_v58 = vpop.f32.mrf.mxu1 }
 0x103   :  { %v1834_v59 = vpop.f32.mrf.mxu0 }
 0x104   :  { %v1856_v60 = vpop.f32.mrf.mxu1 }
 0x105   :  { %v1835_v61 = vpop.f32.mrf.mxu0 }
 0x106   :  { %v1857_v62 = vpop.f32.mrf.mxu1  ;;  %v1836_v11 = vadd.f32 %v1835_v61, %v1834_v59 }
 0x107   :  { %v1837_v63 = vpop.f32.mrf.mxu0  ;;  %v1858_v13 = vadd.f32 %v1857_v62, %v1856_v60 }
 0x108   :  { %v1859_v0 = vpop.f32.mrf.mxu1  ;;  %v1286_v12 = vadd.f32 %v1836_v11, %v1246_v57 }
 0x109   :  { %v1838_v1 = vpop.f32.mrf.mxu0 }
 0x10a   :  { %v1860_v2 = vpop.f32.mrf.mxu1  ;;  %v1326_v15 = vadd.f32 %v1858_v13, %v1286_v12 }
 0x123   :  { %v1878_v3 = vpop.f32.mrf.mxu0 }
 0x125   :  { %v1900_v4 = vpop.f32.mrf.mxu1  ;;  %v1879_v5 = vpop.f32.mrf.mxu0 }
 0x126   :  { %v1880_v14 = vadd.f32 %v1879_v5, %v1878_v3 }
 0x127   :  { %v1901_v6 = vpop.f32.mrf.mxu1  ;;  %v1881_v7 = vpop.f32.mrf.mxu0 }
 0x128   :  { %v1366_v16 = vadd.f32 %v1880_v14, %v1326_v15  ;;  %v1902_v17 = vadd.f32 %v1901_v6, %v1900_v4 }
 0x129   :  { %v1903_v8 = vpop.f32.mrf.mxu1  ;;  %v1882_v9 = vpop.f32.mrf.mxu0 }
 0x12a   :  { %v1406_v21 = vadd.f32 %v1902_v17, %v1366_v16 }
 0x12b   :  { %v1904_v10 = vpop.f32.mrf.mxu1 }
 0x143   :  { %v1922_v18 = vpop.f32.mrf.mxu0 }
 0x145   :  { %v1944_v19 = vpop.f32.mrf.mxu1  ;;  %v1923_v20 = vpop.f32.mrf.mxu0 }
 0x146   :  { %v1924_v22 = vadd.f32 %v1923_v20, %v1922_v18 }
 0x147   :  { %v1945_v23 = vpop.f32.mrf.mxu1  ;;  %v1925_v24 = vpop.f32.mrf.mxu0 }
 0x148   :  { %v1446_v25 = vadd.f32 %v1924_v22, %v1406_v21  ;;  %v1946_v26 = vadd.f32 %v1945_v23, %v1944_v19 }
 0x149   :  { %v1947_v27 = vpop.f32.mrf.mxu1  ;;  %v1926_v29 = vpop.f32.mrf.mxu0 }
 0x14a   :  { %v1486_v30 = vadd.f32 %v1946_v26, %v1446_v25 }
 0x14b   :  { %v1948_v31 = vpop.f32.mrf.mxu1 }
 0x14c   :  { %v1491_v32 = vmax.f32 %v1486_v30, 0.0 }
 0x14e   :  { %v1492_v33 = vpack.c.bf16 %v1491_v32, %v1491_v32 }
 0x150   :  { %1976 = vmatmul.mubr.bf16.vlgmr.msra.gmra.mxu0 %v1492_v33 }
 0x210   :  { %v1598_v36 = vpop.f32.mrf.mxu0 }
 0x211   :  { %v1599_v37 = vadd.f32 %v1765_v35, %v1598_v36 }
 0x212   :  { %v1977_v38 = vpop.f32.mrf.mxu0 }
 0x213   :  { %v1607_v41 = vsel %vm1606_vm1, %v1599_v37, -1e+30 }
 0x214   :  { %v1601_v39 = vpop.f32.mrf.mxu0  ;;  %v1609_v40 = vsel %vm1608_vm2, %v1607_v41, -inf }
 0x215   :  { %1610 = vmax.xlane.f32.xlu0 %v1609_v40 }
 0x216   :  { %v1978_v42 = vpop.f32.mrf.mxu0 }
 0x29e   :  { %v1611_v43 = vpop.xlane.xlu0 %1610 }
 0x29f   :  { %v1612_v44 = vsub.f32 %v1607_v41, %v1611_v43 }
 0x2a1   :  { %v1613_v45 = vmul.f32 1.442695, %v1612_v44 }
 0x2a3   :  { %2121 = vpow2.f32 %v1613_v45 }
 0x2b0   :  { %v2122_v46 = vpop.eup %2121 }
 0x2b1   :  { %v1615_v28 = vsel %vm1608_vm2, %v2122_v46, 0.0 }
 0x2b2   :  { %1616 = vadd.xlane.f32.xlu0 %v1615_v28 }
 0x33b   :  { %v1617_v47 = vpop.xlane.xlu0 %1616 }
 0x33c   :  { %2123 = vlog2.f32 %v1617_v47 }
 0x349   :  { %v2124_v48 = vpop.eup %2123 }
 0x34a   :  { %v1619_v49 = vmul.f32 0.6931472, %v2124_v48 }
 0x34c   :  { %v1620_v50 = vsub.f32 %v1612_v44, %v1619_v49 }
 0x34e   :  { %1621 = vst [vmem:[#allocation2] sm:$0x3] %v1620_v50 }
 0x34f   :  { %2136 = shalt.err (!%p2133_p4)
}
 0x350   :  { %1631 = dma.vmem_to_hbm [thread:$0]  %s1629_s16, 32, %s2635_s5, [#allocation3]  }
 0x351   :  { %2145 = dma.done.wait [#allocation3], 32  }
 0x352   :  { %2146 = vsyncadd [#allocation3], 4294967264 }
 0x353   :  { %1635 = vsyncpa [#allocation3], 1 }

</bundles_post_ra>
